<compile_context>
chip_gen: v6e
topology: v6e:2x2x1
jax: 0.10.0
libtpu: 0.0.40
codegen_flags: <defaults>
</compile_context>

<pallas_src>
import functools
import math

import jax
import jax.numpy as jnp
import numpy as np
from jax.experimental import pallas as pl
from jax.experimental.pallas import tpu as pltpu


# ----------------------------- in-kernel helpers -----------------------------

def _layernorm(x, w, b, eps=1e-5):
    mu = jnp.mean(x, axis=-1, keepdims=True)
    xc = x - mu
    var = jnp.mean(xc * xc, axis=-1, keepdims=True)
    return xc * jax.lax.rsqrt(var + eps) * w + b


def _erf(x):
    # Abramowitz & Stegun 7.1.26 polynomial erf (max abs err ~1.5e-7); maps to
    # VPU (mul/add/where) + EUP (exp, reciprocal).
    a1, a2, a3, a4, a5 = (0.254829592, -0.284496736, 1.421413741,
                          -1.453152027, 1.061405429)
    p = 0.3275911
    ax = jnp.abs(x)
    t = pl.reciprocal(1.0 + p * ax, approx=False)
    poly = ((((a5 * t + a4) * t + a3) * t + a2) * t + a1) * t
    y = 1.0 - poly * jnp.exp(-ax * ax)
    return jnp.where(x >= 0, y, -y)


def _gelu_exact(x):
    # matches torch.nn.GELU() (erf form) to ~1e-7 -- used on the fp32 path.
    return 0.5 * x * (1.0 + _erf(x * (1.0 / math.sqrt(2.0))))


def _gelu_tanh(x):
    # tanh form -> EUP; used on the bf16 path (error << bf16 noise).
    c = math.sqrt(2.0 / math.pi)
    return 0.5 * x * (1.0 + jnp.tanh(c * (x + 0.044715 * x * x * x)))


# ----------------------- kernel 1: LN1 + QKV projection -----------------------

def qkv_project_kernel(n_heads,
                       x_ref,     # (tn, E)  node tile of (padded) x
                       vec1_ref,  # (2, E)   [ln1_w ; ln1_b]
                       wqkv_ref,  # (E, 3E)  packed [Wq*s | Wk | Wv]
                       bqkv_ref,  # (1, 3E)  packed [bq*s | bk | bv]
                       q_ref,     # (H, tn, dh)
                       k_ref,     # (H, tn, dh)
                       v_ref):    # (H, tn, dh)
    tn, E = x_ref.shape
    dh = E // n_heads

    xp = _layernorm(x_ref[...], vec1_ref[0:1, :], vec1_ref[1:2, :])
    qkv = jnp.dot(xp.astype(wqkv_ref.dtype), wqkv_ref[...],
                  preferred_element_type=jnp.float32) + bqkv_ref[...]

    # Head-major relayout once per node tile (amortized over all query tiles).
    for h in range(n_heads):
        lo = h * dh
        q_ref[h] = qkv[:, lo:lo + dh].astype(q_ref.dtype)
        k_ref[h] = qkv[:, E + lo:E + lo + dh].astype(k_ref.dtype)
        v_ref[h] = qkv[:, 2 * E + lo:2 * E + lo + dh].astype(v_ref.dtype)


# ---------------------- kernel 2: attention + FFN per tile --------------------

def attn_ffn_kernel(n_heads, n_valid, use_tanh_gelu,
                    x_ref,     # (tq, E)      query tile of x (residual)
                    q_ref,     # (H, tq, dh)  query tile of scaled q
                    k_ref,     # (H, Np, dh)  all keys   (grid-invariant)
                    v_ref,     # (H, Np, dh)  all values (grid-invariant)
                    sp_ref,    # (H, tq, Np)  spatial embedding tile
                    eg_ref,    # (H, tq, Np)  edge embedding tile
                    wo_ref,    # (E, E)
                    w1_ref,    # (E, F)
                    b1_ref,    # (1, F)
                    w2_ref,    # (F, E)
                    vec2_ref,  # (4, E)  [ln2_w ; ln2_b ; bo ; b2]
                    out_ref,   # (tq, E)
                    attn_ref,  # (H, tq, Np)
                    ctx_ref):  # (tq, E) VMEM scratch (per-head context cols)
    tq, E = x_ref.shape
    dh = E // n_heads
    Np = k_ref.shape[1]

    ln2_w = vec2_ref[0:1, :]
    ln2_b = vec2_ref[1:2, :]
    bo = vec2_ref[2:3, :]
    b2 = vec2_ref[3:4, :]

    need_mask = Np > n_valid
    if need_mask:
        key_valid = jax.lax.broadcasted_iota(jnp.int32, (1, Np), 1) < n_valid

    for h in range(n_heads):                    # static unrolled head loop
        qh = q_ref[h]                           # (tq, dh)  (already * 1/sqrt(dh))
        kh = k_ref[h]                           # (Np, dh)
        vh = v_ref[h]                           # (Np, dh)

        s = jax.lax.dot_general(qh, kh, (((1,), (1,)), ((), ())),
                                preferred_element_type=jnp.float32)  # (tq, Np)
        s = s + sp_ref[h] + eg_ref[h]           # in-kernel bias add (VPU filler)
        if need_mask:
            s = jnp.where(key_valid, s, jnp.float32(-1e30))
        m = jnp.max(s, axis=-1, keepdims=True)
        e = jnp.exp(s - m)
        inv = pl.reciprocal(jnp.sum(e, axis=-1, keepdims=True), approx=False)
        a = e * inv
        attn_ref[h] = a.astype(attn_ref.dtype)  # module returns attention
        ctx_ref[:, h * dh:(h + 1) * dh] = jnp.dot(
            a.astype(vh.dtype), vh, preferred_element_type=jnp.float32)

    # Single full-depth W_o matmul over the assembled (tq, E) context.
    attn_out = jnp.dot(ctx_ref[...].astype(wo_ref.dtype), wo_ref[...],
                       preferred_element_type=jnp.float32) + bo
    x1 = x_ref[...] + attn_out                  # residual 1

    # --- pre-norm + FFN ---
    xp2 = _layernorm(x1, ln2_w, ln2_b)
    h1 = jnp.dot(xp2.astype(w1_ref.dtype), w1_ref[...],
                 preferred_element_type=jnp.float32) + b1_ref[...]
    h1 = _gelu_tanh(h1) if use_tanh_gelu else _gelu_exact(h1)
    h2 = jnp.dot(h1.astype(w2_ref.dtype), w2_ref[...],
                 preferred_element_type=jnp.float32) + b2

    out_ref[...] = (x1 + h2).astype(out_ref.dtype)   # residual 2


# --------------------------------- wrapper ------------------------------------

def _invariant_spec(arr):
    """Whole-array-resident VMEM block; single-buffered (index never changes)."""
    nd = arr.ndim
    idx = lambda *_: (0,) * nd
    try:
        return pl.BlockSpec(arr.shape, idx, pipeline_mode=pl.Buffered(1))
    except (TypeError, AttributeError):   # older jax without pipeline_mode
        return pl.BlockSpec(arr.shape, idx)


def graphormer_encoder_layer(x, spatial_emb, edge_emb, params, n_heads, *,
                             compute_dtype=jnp.float32, tq=128,
                             vmem_limit_bytes=32 * 1024 * 1024):
    # vmem_limit_bytes: 32 MiB is safe on v5e/v6e/v7x; raise (~96 MiB) on
    # v5e/v6e with larger tq, keep <= ~56 MiB on v7x (64 MiB physical VMEM).
    n_nodes, E = x.shape
    H = n_heads
    assert E % H == 0
    dh = E // H
    use_bf16 = jnp.dtype(compute_dtype) == jnp.dtype(jnp.bfloat16)
    cdt = jnp.bfloat16 if use_bf16 else jnp.float32

    # ---- pad node count to a multiple of 128: lane-dense bias/attn last dim,
    #      arbitrary graph sizes.  (In a full model the graph tensors would be
    #      produced pre-padded; here the pads are tiny wrapper ops.) ----
    Np = ((n_nodes + 127) // 128) * 128
    pad_n = Np - n_nodes
    x_p = jnp.pad(x, ((0, pad_n), (0, 0))) if pad_n else x
    sp_p = (jnp.pad(spatial_emb, ((0, 0), (0, pad_n), (0, pad_n)))
            if pad_n else spatial_emb).astype(cdt)
    eg_p = (jnp.pad(edge_emb, ((0, 0), (0, pad_n), (0, pad_n)))
            if pad_n else edge_emb).astype(cdt)

    tq = min(tq, Np)
    if Np % tq != 0:
        tq = 128
    n_tiles = Np // tq

    # ---- parameter-prep-time packing (free at runtime in a real model) ----
    scale = 1.0 / math.sqrt(dh)
    wqkv = jnp.concatenate([params["wq"] * scale, params["wk"], params["wv"]],
                           axis=1).astype(cdt)              # (E, 3E)
    bqkv = jnp.concatenate([params["bq"] * scale, params["bk"], params["bv"]],
                           axis=1)                           # (1, 3E) fp32
    vec1 = jnp.concatenate([params["ln1_w"], params["ln1_b"]], axis=0)   # (2,E)
    vec2 = jnp.concatenate([params["ln2_w"], params["ln2_b"],
                            params["bo"], params["b2"]], axis=0)         # (4,E)
    wo = params["wo"].astype(cdt)
    w1 = params["w1"].astype(cdt)
    w2 = params["w2"].astype(cdt)
    b1 = params["b1"]

    cparams = pltpu.CompilerParams(
        dimension_semantics=("parallel",),
        vmem_limit_bytes=vmem_limit_bytes)

    # ---- kernel 1: LN1 + packed QKV projection, once over all nodes ----
    q, k, v = pl.pallas_call(
        functools.partial(qkv_project_kernel, H),
        out_shape=tuple(jax.ShapeDtypeStruct((H, Np, dh), cdt) for _ in range(3)),
        grid_spec=pltpu.PrefetchScalarGridSpec(
            num_scalar_prefetch=0,
            grid=(n_tiles,),
            in_specs=[
                pl.BlockSpec((tq, E), lambda i: (i, 0)),
                _invariant_spec(vec1),
                _invariant_spec(wqkv),
                _invariant_spec(bqkv),
            ],
            out_specs=tuple(pl.BlockSpec((H, tq, dh), lambda i: (0, i, 0))
                            for _ in range(3)),
        ),
        compiler_params=cparams,
    )(x_p, vec1, wqkv, bqkv)

    # ---- kernel 2: attention + FFN, gridded over query tiles ----
    out_p, attn_p = pl.pallas_call(
        functools.partial(attn_ffn_kernel, H, n_nodes, use_bf16),
        out_shape=(jax.ShapeDtypeStruct((Np, E), jnp.float32),
                   jax.ShapeDtypeStruct((H, Np, Np), cdt)),
        grid_spec=pltpu.PrefetchScalarGridSpec(
            num_scalar_prefetch=0,
            grid=(n_tiles,),
            in_specs=[
                pl.BlockSpec((tq, E), lambda i: (i, 0)),          # x tile
                pl.BlockSpec((H, tq, dh), lambda i: (0, i, 0)),   # q tile
                _invariant_spec(k),
                _invariant_spec(v),
                pl.BlockSpec((H, tq, Np), lambda i: (0, i, 0)),   # spatial tile
                pl.BlockSpec((H, tq, Np), lambda i: (0, i, 0)),   # edge tile
                _invariant_spec(wo),
                _invariant_spec(w1),
                _invariant_spec(b1),
                _invariant_spec(w2),
                _invariant_spec(vec2),
            ],
            out_specs=(pl.BlockSpec((tq, E), lambda i: (i, 0)),
                       pl.BlockSpec((H, tq, Np), lambda i: (0, i, 0))),
            scratch_shapes=[pltpu.VMEM((tq, E), jnp.float32)],
        ),
        compiler_params=cparams,
    )(x_p, q, k, v, sp_p, eg_p, wo, w1, b1, w2, vec2)

    out = out_p[:n_nodes]
    attn = attn_p[:, :n_nodes, :n_nodes]
    return out, attn


# ------------------------- pure-JAX reference (check) -------------------------

def reference(x, sp, eg, params, n_heads):
    def ln(x, w, b, eps=1e-5):
        mu = jnp.mean(x, -1, keepdims=True)
        var = jnp.mean((x - mu) ** 2, -1, keepdims=True)
        return (x - mu) / jnp.sqrt(var + eps) * w + b

    n, e = x.shape
    dh = e // n_heads
    xp = ln(x, params["ln1_w"], params["ln1_b"])
    q = xp @ params["wq"] + params["bq"]
    k = xp @ params["wk"] + params["bk"]
    v = xp @ params["wv"] + params["bv"]
    q = q.reshape(n, n_heads, dh).transpose(1, 0, 2)
    k = k.reshape(n, n_heads, dh).transpose(1, 0, 2)
    v = v.reshape(n, n_heads, dh).transpose(1, 0, 2)
    s = jnp.einsum("hqd,hkd->hqk", q, k) / math.sqrt(dh) + sp + eg
    a = jax.nn.softmax(s, axis=-1)
    o = jnp.einsum("hqk,hkd->hqd", a, v).transpose(1, 0, 2).reshape(n, e)
    o = o @ params["wo"] + params["bo"]
    x = x + o
    xp2 = ln(x, params["ln2_w"], params["ln2_b"])
    h1 = jax.nn.gelu(xp2 @ params["w1"] + params["b1"], approximate=False)
    x = x + (h1 @ params["w2"] + params["b2"])
    return x, a


# ----------------------------------- main --------------------------------------

def init_params(key, embed_dim, dim_ff):
    def lin(k, din, dout):
        kw, kb = jax.random.split(k)
        lim = 1.0 / math.sqrt(din)
        w = jax.random.uniform(kw, (din, dout), jnp.float32, -lim, lim)
        b = jax.random.uniform(kb, (1, dout), jnp.float32, -lim, lim)
        return w, b

    ks = jax.random.split(key, 6)
    wq, bq = lin(ks[0], embed_dim, embed_dim)
    wk, bk = lin(ks[1], embed_dim, embed_dim)
    wv, bv = lin(ks[2], embed_dim, embed_dim)
    wo, bo = lin(ks[3], embed_dim, embed_dim)
    w1, b1 = lin(ks[4], embed_dim, dim_ff)
    w2, b2 = lin(ks[5], dim_ff, embed_dim)
    return {
        "ln1_w": jnp.ones((1, embed_dim), jnp.float32),
        "ln1_b": jnp.zeros((1, embed_dim), jnp.float32),
        "ln2_w": jnp.ones((1, embed_dim), jnp.float32),
        "ln2_b": jnp.zeros((1, embed_dim), jnp.float32),
        "wq": wq, "bq": bq, "wk": wk, "bk": bk, "wv": wv, "bv": bv,
        "wo": wo, "bo": bo, "w1": w1, "b1": b1, "w2": w2, "b2": b2,
    }


if __name__ == "__main__":
    n_nodes, n_heads, embed_dim, dim_ff = 8, 4, 32, 64

    key = jax.random.PRNGKey(0)
    kx, ksp, keg, kp = jax.random.split(key, 4)
    x = jax.random.normal(kx, (n_nodes, embed_dim), jnp.float32)
    spatial_emb = 0.1 * jax.random.normal(ksp, (n_heads, n_nodes, n_nodes), jnp.float32)
    edge_emb = 0.1 * jax.random.normal(keg, (n_heads, n_nodes, n_nodes), jnp.float32)
    params = init_params(kp, embed_dim, dim_ff)

    ref_out, ref_attn = reference(x, spatial_emb, edge_emb, params, n_heads)

    # fp32 path: tight structural/numerical check against the fp32 reference.
    out, attn = graphormer_encoder_layer(x, spatial_emb, edge_emb, params,
                                         n_heads, compute_dtype=jnp.float32)
    jax.block_until_ready((out, attn))
    np.testing.assert_allclose(np.asarray(out), np.asarray(ref_out),
                               atol=1e-4, rtol=1e-4)
    np.testing.assert_allclose(np.asarray(attn), np.asarray(ref_attn),
                               atol=1e-4, rtol=1e-4)

    # bf16 MXU path (production config per perf review): relaxed tolerance.
    out16, attn16 = graphormer_encoder_layer(x, spatial_emb, edge_emb, params,
                                             n_heads, compute_dtype=jnp.bfloat16)
    jax.block_until_ready((out16, attn16))
    np.testing.assert_allclose(np.asarray(out16), np.asarray(ref_out),
                               atol=1.5e-1, rtol=5e-2)
    np.testing.assert_allclose(np.asarray(attn16.astype(jnp.float32)),
                               np.asarray(ref_attn), atol=5e-2, rtol=5e-2)

    print("KERNEL_OK")
</pallas_src>

<mosaic_0001>
module attributes {stable_mosaic.version = 11 : i64} {
  func.func @qkv_project_kernel(%arg0: i32, %arg1: memref<128x32xf32, #tpu.memory_space<vmem>>, %arg2: memref<2x32xf32, #tpu.memory_space<vmem>>, %arg3: memref<32x96xf32, #tpu.memory_space<vmem>>, %arg4: memref<1x96xf32, #tpu.memory_space<vmem>>, %arg5: memref<4x128x8xf32, #tpu.memory_space<vmem>>, %arg6: memref<4x128x8xf32, #tpu.memory_space<vmem>>, %arg7: memref<4x128x8xf32, #tpu.memory_space<vmem>>) attributes {dimension_semantics = [#tpu.dimension_semantics<parallel>], iteration_bounds = array<i64: 1>, scalar_prefetch = 0 : i64, scratch_operands = 0 : i64, tpu.core_type = #tpu.core_type<tc>, window_params = [{transform_indices = @transform_0, window_bounds = array<i64: 128, 32>}, {pipeline_mode = #tpu.pipeline_mode<synchronous>, transform_indices = @transform_1, window_bounds = array<i64: 2, 32>}, {pipeline_mode = #tpu.pipeline_mode<synchronous>, transform_indices = @transform_2, window_bounds = array<i64: 32, 96>}, {pipeline_mode = #tpu.pipeline_mode<synchronous>, transform_indices = @transform_3, window_bounds = array<i64: 1, 96>}, {transform_indices = @transform_4, window_bounds = array<i64: 4, 128, 8>}, {transform_indices = @transform_5, window_bounds = array<i64: 4, 128, 8>}, {transform_indices = @transform_6, window_bounds = array<i64: 4, 128, 8>}]} {
    %c0 = arith.constant 0 : index
    %c0_0 = arith.constant 0 : index
    %0 = vector.load %arg1[%c0, %c0_0] : memref<128x32xf32, #tpu.memory_space<vmem>>, vector<128x32xf32>
    %c0_1 = arith.constant 0 : index
    %c0_2 = arith.constant 0 : index
    %1 = vector.load %arg2[%c0_1, %c0_2] : memref<2x32xf32, #tpu.memory_space<vmem>>, vector<1x32xf32>
    %c1 = arith.constant 1 : index
    %c0_3 = arith.constant 0 : index
    %2 = vector.load %arg2[%c1, %c0_3] : memref<2x32xf32, #tpu.memory_space<vmem>>, vector<1x32xf32>
    %cst = arith.constant dense<0.000000e+00> : vector<128xf32>
    %3 = vector.multi_reduction <add>, %0, %cst [1] : vector<128x32xf32> to vector<128xf32>
    %4 = vector.shape_cast %3 : vector<128xf32> to vector<128x1xf32>
    %cst_4 = arith.constant 3.200000e+01 : f32
    %5 = vector.broadcast %cst_4 : f32 to vector<128x1xf32>
    %6 = arith.divf %4, %5 : vector<128x1xf32>
    %7 = vector.broadcast %6 : vector<128x1xf32> to vector<128x32xf32>
    %8 = arith.subf %0, %7 : vector<128x32xf32>
    %9 = arith.mulf %8, %8 : vector<128x32xf32>
    %cst_5 = arith.constant dense<0.000000e+00> : vector<128xf32>
    %10 = vector.multi_reduction <add>, %9, %cst_5 [1] : vector<128x32xf32> to vector<128xf32>
    %11 = vector.shape_cast %10 : vector<128xf32> to vector<128x1xf32>
    %cst_6 = arith.constant 3.200000e+01 : f32
    %12 = vector.broadcast %cst_6 : f32 to vector<128x1xf32>
    %13 = arith.divf %11, %12 : vector<128x1xf32>
    %cst_7 = arith.constant 9.99999974E-6 : f32
    %14 = vector.broadcast %cst_7 : f32 to vector<128x1xf32>
    %15 = arith.addf %13, %14 : vector<128x1xf32>
    %16 = math.rsqrt %15 : vector<128x1xf32>
    %17 = vector.broadcast %16 : vector<128x1xf32> to vector<128x32xf32>
    %18 = arith.mulf %8, %17 : vector<128x32xf32>
    %19 = vector.broadcast %1 : vector<1x32xf32> to vector<128x32xf32>
    %20 = arith.mulf %18, %19 : vector<128x32xf32>
    %21 = vector.broadcast %2 : vector<1x32xf32> to vector<128x32xf32>
    %22 = arith.addf %20, %21 : vector<128x32xf32>
    %c0_8 = arith.constant 0 : index
    %c0_9 = arith.constant 0 : index
    %23 = vector.load %arg3[%c0_8, %c0_9] : memref<32x96xf32, #tpu.memory_space<vmem>>, vector<32x96xf32>
    %cst_10 = arith.constant dense<0.000000e+00> : vector<128x96xf32>
    %24 = tpu.matmul %22, %23, %cst_10 {dimension_numbers = #tpu.dot_dimension_numbers<[1], [0], [0], [1], [0, 0, 1, 1], [], []>} : vector<128x32xf32>, vector<32x96xf32>, vector<128x96xf32> -> vector<128x96xf32>
    %c0_11 = arith.constant 0 : index
    %c0_12 = arith.constant 0 : index
    %25 = vector.load %arg4[%c0_11, %c0_12] : memref<1x96xf32, #tpu.memory_space<vmem>>, vector<1x96xf32>
    %26 = vector.broadcast %25 : vector<1x96xf32> to vector<128x96xf32>
    %27 = arith.addf %24, %26 : vector<128x96xf32>
    %28 = vector.extract_strided_slice %27 {offsets = [0, 0], sizes = [128, 8], strides = [1, 1]} : vector<128x96xf32> to vector<128x8xf32>
    %c0_13 = arith.constant 0 : index
    %c0_14 = arith.constant 0 : index
    %c0_15 = arith.constant 0 : index
    %29 = vector.load %arg5[%c0_13, %c0_14, %c0_15] : memref<4x128x8xf32, #tpu.memory_space<vmem>>, vector<1x128x8xf32>
    %30 = vector.shape_cast %29 : vector<1x128x8xf32> to vector<128x8xf32>
    %31 = vector.shape_cast %28 : vector<128x8xf32> to vector<1x128x8xf32>
    tpu.vector_store %arg5[%c0_13, %c0_14, %c0_15], %31 {strides = array<i32>} : memref<4x128x8xf32, #tpu.memory_space<vmem>>, vector<1x128x8xf32>,
    %32 = vector.extract_strided_slice %27 {offsets = [0, 32], sizes = [128, 8], strides = [1, 1]} : vector<128x96xf32> to vector<128x8xf32>
    %c0_16 = arith.constant 0 : index
    %c0_17 = arith.constant 0 : index
    %c0_18 = arith.constant 0 : index
    %33 = vector.load %arg6[%c0_16, %c0_17, %c0_18] : memref<4x128x8xf32, #tpu.memory_space<vmem>>, vector<1x128x8xf32>
    %34 = vector.shape_cast %33 : vector<1x128x8xf32> to vector<128x8xf32>
    %35 = vector.shape_cast %32 : vector<128x8xf32> to vector<1x128x8xf32>
    tpu.vector_store %arg6[%c0_16, %c0_17, %c0_18], %35 {strides = array<i32>} : memref<4x128x8xf32, #tpu.memory_space<vmem>>, vector<1x128x8xf32>,
    %36 = vector.extract_strided_slice %27 {offsets = [0, 64], sizes = [128, 8], strides = [1, 1]} : vector<128x96xf32> to vector<128x8xf32>
    %c0_19 = arith.constant 0 : index
    %c0_20 = arith.constant 0 : index
    %c0_21 = arith.constant 0 : index
    %37 = vector.load %arg7[%c0_19, %c0_20, %c0_21] : memref<4x128x8xf32, #tpu.memory_space<vmem>>, vector<1x128x8xf32>
    %38 = vector.shape_cast %37 : vector<1x128x8xf32> to vector<128x8xf32>
    %39 = vector.shape_cast %36 : vector<128x8xf32> to vector<1x128x8xf32>
    tpu.vector_store %arg7[%c0_19, %c0_20, %c0_21], %39 {strides = array<i32>} : memref<4x128x8xf32, #tpu.memory_space<vmem>>, vector<1x128x8xf32>,
    %40 = vector.extract_strided_slice %27 {offsets = [0, 8], sizes = [128, 8], strides = [1, 1]} : vector<128x96xf32> to vector<128x8xf32>
    %c1_22 = arith.constant 1 : index
    %c0_23 = arith.constant 0 : index
    %c0_24 = arith.constant 0 : index
    %41 = vector.load %arg5[%c1_22, %c0_23, %c0_24] : memref<4x128x8xf32, #tpu.memory_space<vmem>>, vector<1x128x8xf32>
    %42 = vector.shape_cast %41 : vector<1x128x8xf32> to vector<128x8xf32>
    %43 = vector.shape_cast %40 : vector<128x8xf32> to vector<1x128x8xf32>
    tpu.vector_store %arg5[%c1_22, %c0_23, %c0_24], %43 {strides = array<i32>} : memref<4x128x8xf32, #tpu.memory_space<vmem>>, vector<1x128x8xf32>,
    %44 = vector.extract_strided_slice %27 {offsets = [0, 40], sizes = [128, 8], strides = [1, 1]} : vector<128x96xf32> to vector<128x8xf32>
    %c1_25 = arith.constant 1 : index
    %c0_26 = arith.constant 0 : index
    %c0_27 = arith.constant 0 : index
    %45 = vector.load %arg6[%c1_25, %c0_26, %c0_27] : memref<4x128x8xf32, #tpu.memory_space<vmem>>, vector<1x128x8xf32>
    %46 = vector.shape_cast %45 : vector<1x128x8xf32> to vector<128x8xf32>
    %47 = vector.shape_cast %44 : vector<128x8xf32> to vector<1x128x8xf32>
    tpu.vector_store %arg6[%c1_25, %c0_26, %c0_27], %47 {strides = array<i32>} : memref<4x128x8xf32, #tpu.memory_space<vmem>>, vector<1x128x8xf32>,
    %48 = vector.extract_strided_slice %27 {offsets = [0, 72], sizes = [128, 8], strides = [1, 1]} : vector<128x96xf32> to vector<128x8xf32>
    %c1_28 = arith.constant 1 : index
    %c0_29 = arith.constant 0 : index
    %c0_30 = arith.constant 0 : index
    %49 = vector.load %arg7[%c1_28, %c0_29, %c0_30] : memref<4x128x8xf32, #tpu.memory_space<vmem>>, vector<1x128x8xf32>
    %50 = vector.shape_cast %49 : vector<1x128x8xf32> to vector<128x8xf32>
    %51 = vector.shape_cast %48 : vector<128x8xf32> to vector<1x128x8xf32>
    tpu.vector_store %arg7[%c1_28, %c0_29, %c0_30], %51 {strides = array<i32>} : memref<4x128x8xf32, #tpu.memory_space<vmem>>, vector<1x128x8xf32>,
    %52 = vector.extract_strided_slice %27 {offsets = [0, 16], sizes = [128, 8], strides = [1, 1]} : vector<128x96xf32> to vector<128x8xf32>
    %c2 = arith.constant 2 : index
    %c0_31 = arith.constant 0 : index
    %c0_32 = arith.constant 0 : index
    %53 = vector.load %arg5[%c2, %c0_31, %c0_32] : memref<4x128x8xf32, #tpu.memory_space<vmem>>, vector<1x128x8xf32>
    %54 = vector.shape_cast %53 : vector<1x128x8xf32> to vector<128x8xf32>
    %55 = vector.shape_cast %52 : vector<128x8xf32> to vector<1x128x8xf32>
    tpu.vector_store %arg5[%c2, %c0_31, %c0_32], %55 {strides = array<i32>} : memref<4x128x8xf32, #tpu.memory_space<vmem>>, vector<1x128x8xf32>,
    %56 = vector.extract_strided_slice %27 {offsets = [0, 48], sizes = [128, 8], strides = [1, 1]} : vector<128x96xf32> to vector<128x8xf32>
    %c2_33 = arith.constant 2 : index
    %c0_34 = arith.constant 0 : index
    %c0_35 = arith.constant 0 : index
    %57 = vector.load %arg6[%c2_33, %c0_34, %c0_35] : memref<4x128x8xf32, #tpu.memory_space<vmem>>, vector<1x128x8xf32>
    %58 = vector.shape_cast %57 : vector<1x128x8xf32> to vector<128x8xf32>
    %59 = vector.shape_cast %56 : vector<128x8xf32> to vector<1x128x8xf32>
    tpu.vector_store %arg6[%c2_33, %c0_34, %c0_35], %59 {strides = array<i32>} : memref<4x128x8xf32, #tpu.memory_space<vmem>>, vector<1x128x8xf32>,
    %60 = vector.extract_strided_slice %27 {offsets = [0, 80], sizes = [128, 8], strides = [1, 1]} : vector<128x96xf32> to vector<128x8xf32>
    %c2_36 = arith.constant 2 : index
    %c0_37 = arith.constant 0 : index
    %c0_38 = arith.constant 0 : index
    %61 = vector.load %arg7[%c2_36, %c0_37, %c0_38] : memref<4x128x8xf32, #tpu.memory_space<vmem>>, vector<1x128x8xf32>
    %62 = vector.shape_cast %61 : vector<1x128x8xf32> to vector<128x8xf32>
    %63 = vector.shape_cast %60 : vector<128x8xf32> to vector<1x128x8xf32>
    tpu.vector_store %arg7[%c2_36, %c0_37, %c0_38], %63 {strides = array<i32>} : memref<4x128x8xf32, #tpu.memory_space<vmem>>, vector<1x128x8xf32>,
    %64 = vector.extract_strided_slice %27 {offsets = [0, 24], sizes = [128, 8], strides = [1, 1]} : vector<128x96xf32> to vector<128x8xf32>
    %c3 = arith.constant 3 : index
    %c0_39 = arith.constant 0 : index
    %c0_40 = arith.constant 0 : index
    %65 = vector.load %arg5[%c3, %c0_39, %c0_40] : memref<4x128x8xf32, #tpu.memory_space<vmem>>, vector<1x128x8xf32>
    %66 = vector.shape_cast %65 : vector<1x128x8xf32> to vector<128x8xf32>
    %67 = vector.shape_cast %64 : vector<128x8xf32> to vector<1x128x8xf32>
    tpu.vector_store %arg5[%c3, %c0_39, %c0_40], %67 {strides = array<i32>} : memref<4x128x8xf32, #tpu.memory_space<vmem>>, vector<1x128x8xf32>,
    %68 = vector.extract_strided_slice %27 {offsets = [0, 56], sizes = [128, 8], strides = [1, 1]} : vector<128x96xf32> to vector<128x8xf32>
    %c3_41 = arith.constant 3 : index
    %c0_42 = arith.constant 0 : index
    %c0_43 = arith.constant 0 : index
    %69 = vector.load %arg6[%c3_41, %c0_42, %c0_43] : memref<4x128x8xf32, #tpu.memory_space<vmem>>, vector<1x128x8xf32>
    %70 = vector.shape_cast %69 : vector<1x128x8xf32> to vector<128x8xf32>
    %71 = vector.shape_cast %68 : vector<128x8xf32> to vector<1x128x8xf32>
    tpu.vector_store %arg6[%c3_41, %c0_42, %c0_43], %71 {strides = array<i32>} : memref<4x128x8xf32, #tpu.memory_space<vmem>>, vector<1x128x8xf32>,
    %72 = vector.extract_strided_slice %27 {offsets = [0, 88], sizes = [128, 8], strides = [1, 1]} : vector<128x96xf32> to vector<128x8xf32>
    %c3_44 = arith.constant 3 : index
    %c0_45 = arith.constant 0 : index
    %c0_46 = arith.constant 0 : index
    %73 = vector.load %arg7[%c3_44, %c0_45, %c0_46] : memref<4x128x8xf32, #tpu.memory_space<vmem>>, vector<1x128x8xf32>
    %74 = vector.shape_cast %73 : vector<1x128x8xf32> to vector<128x8xf32>
    %75 = vector.shape_cast %72 : vector<128x8xf32> to vector<1x128x8xf32>
    tpu.vector_store %arg7[%c3_44, %c0_45, %c0_46], %75 {strides = array<i32>} : memref<4x128x8xf32, #tpu.memory_space<vmem>>, vector<1x128x8xf32>,
    return
  }
  func.func @transform_0(%arg0: i32) -> (i32, i32) {
    %c0_i32 = arith.constant 0 : i32
    %c0_i32_0 = arith.constant 0 : i32
    return %arg0, %c0_i32 : i32, i32
  }
  func.func @transform_1(%arg0: i32) -> (i32, i32) {
    %c0_i32 = arith.constant 0 : i32
    %c0_i32_0 = arith.constant 0 : i32
    %c0_i32_1 = arith.constant 0 : i32
    return %c0_i32, %c0_i32_0 : i32, i32
  }
  func.func @transform_2(%arg0: i32) -> (i32, i32) {
    %c0_i32 = arith.constant 0 : i32
    %c0_i32_0 = arith.constant 0 : i32
    %c0_i32_1 = arith.constant 0 : i32
    return %c0_i32, %c0_i32_0 : i32, i32
  }
  func.func @transform_3(%arg0: i32) -> (i32, i32) {
    %c0_i32 = arith.constant 0 : i32
    %c0_i32_0 = arith.constant 0 : i32
    %c0_i32_1 = arith.constant 0 : i32
    return %c0_i32, %c0_i32_0 : i32, i32
  }
  func.func @transform_4(%arg0: i32) -> (i32, i32, i32) {
    %c0_i32 = arith.constant 0 : i32
    %c0_i32_0 = arith.constant 0 : i32
    %c0_i32_1 = arith.constant 0 : i32
    return %c0_i32, %arg0, %c0_i32_0 : i32, i32, i32
  }
  func.func @transform_5(%arg0: i32) -> (i32, i32, i32) {
    %c0_i32 = arith.constant 0 : i32
    %c0_i32_0 = arith.constant 0 : i32
    %c0_i32_1 = arith.constant 0 : i32
    return %c0_i32, %arg0, %c0_i32_0 : i32, i32, i32
  }
  func.func @transform_6(%arg0: i32) -> (i32, i32, i32) {
    %c0_i32 = arith.constant 0 : i32
    %c0_i32_0 = arith.constant 0 : i32
    %c0_i32_1 = arith.constant 0 : i32
    return %c0_i32, %arg0, %c0_i32_0 : i32, i32, i32
  }
}

</mosaic_0001>

<bundles_post_ra>
// kernel: tpu_custom_call.1
= control target key start
LH: loop header
LB: loop body
LE: loop exit
PB: predicated region body
PF: predicated region fallthrough
CT: control target
= control target key end

     0   :  { %vm38_vm0 = vcmask 261120   ;;  %vm492_vm1 = vcmask 64512   ;;  %s1516_s18 = smov 96   ;;  %s1517_s12 = smov 64   ;;  %s2999_s0 = inlined_call_operand.vmem [shape: f32[128,32], index: 0, kind: input, shape index: {}]   ;;  %s3000_s2 = inlined_call_operand.vmem [shape: f32[32,96], index: 2, kind: input, shape index: {}]   ;;  %s3001_s1 = inlined_call_operand.vmem [shape: f32[2,32], index: 1, kind: input, shape index: {}]   ;;  %s3002_s3 = inlined_call_operand.vmem [shape: f32[1,96], index: 3, kind: input, shape index: {}]   ;;  %s3003_s4 = inlined_call_operand.vmem [shape: f32[4,128,8], index: 4, kind: output, shape index: {0}]   ;;  %s3004_s5 = inlined_call_operand.vmem [shape: f32[4,128,8], index: 5, kind: output, shape index: {1}]   ;;  %s3005_s6 = inlined_call_operand.vmem [shape: f32[4,128,8], index: 6, kind: output, shape index: {2}]  }
   0x1   :  { %v21_v0 = vld [vmem:[%s2999_s0 + $0x8] sm:$0xff]  ;;  %v20_v1 = vld [vmem:[%s2999_s0] sm:$0xff]  ;;  %v22_v8 = vld [vmem:[%s2999_s0 + $0x10] sm:$0xff]  ;;  %s1518_s20 = smov 120   ;;  %s1519_s23 = smov 88  }
   0x2   :  { %v1571_v2 = vld [vmem:[%s2999_s0 + $0x40] sm:$0xff]  ;;  %v42_v3 = vsel %vm38_vm0, %v21_v0, 0.0  ;;  %v39_v4 = vsel %vm38_vm0, %v20_v1, 0.0  ;;  %v1578_v5 = vld [vmem:[%s2999_s0 + $0x48] sm:$0xff]  ;;  %v1590_v9 = vld [vmem:[%s2999_s0 + $0x50] sm:$0xff]  ;;  %v45_v10 = vsel %vm38_vm0, %v22_v8, 0.0 }
   0x3   :  { %43 = vadd.xlane.f32.xlu1 %v42_v3  ;;  %40 = vadd.xlane.f32.xlu0 %v39_v4  ;;  %v63_v6 = vsel %vm38_vm0, %v1571_v2, 0.0  ;;  %v66_v7 = vsel %vm38_vm0, %v1578_v5, 0.0  ;;  %v69_v11 = vsel %vm38_vm0, %v1590_v9, 0.0  ;;  %v23_v12 = vld [vmem:[%s2999_s0 + $0x18] sm:$0xff]  ;;  %v24_v16 = vld [vmem:[%s2999_s0 + $0x20] sm:$0xff]  ;;  %v25_v20 = vld [vmem:[%s2999_s0 + $0x28] sm:$0xff] }
   0x4   :  { %v1601_v13 = vld [vmem:[%s2999_s0 + $0x58] sm:$0xff]  ;;  %v48_v14 = vsel %vm38_vm0, %v23_v12, 0.0  ;;  %v1612_v17 = vld [vmem:[%s2999_s0 + $0x60] sm:$0xff]  ;;  %v51_v18 = vsel %vm38_vm0, %v24_v16, 0.0  ;;  %v1623_v21 = vld [vmem:[%s2999_s0 + $0x68] sm:$0xff]  ;;  %v54_v22 = vsel %vm38_vm0, %v25_v20, 0.0 }
   0x5   :  { %v72_v15 = vsel %vm38_vm0, %v1601_v13, 0.0  ;;  %v75_v19 = vsel %vm38_vm0, %v1612_v17, 0.0  ;;  %v78_v23 = vsel %vm38_vm0, %v1623_v21, 0.0  ;;  %v26_v24 = vld [vmem:[%s2999_s0 + $0x30] sm:$0xff]  ;;  %v1642_v28 = vld [vmem:[%s2999_s0 + $0x38] sm:$0xff]  ;;  %s1520_s24 = smov 56  }
   0x6   :  { %v1634_v25 = vld [vmem:[%s2999_s0 + $0x70] sm:$0xff]  ;;  %v57_v26 = vsel %vm38_vm0, %v26_v24, 0.0  ;;  %v1647_v29 = vld [vmem:[%s2999_s0 + $0x78] sm:$0xff]  ;;  %v60_v30 = vsel %vm38_vm0, %v1642_v28, 0.0  ;;  %s1521_s25 = smov 112   ;;  %s1522_s26 = smov 80  }
   0x7   :  { %64 = vadd.xlane.f32.xlu0 %v63_v6  ;;  %67 = vadd.xlane.f32.xlu1 %v66_v7  ;;  %v81_v27 = vsel %vm38_vm0, %v1634_v25, 0.0  ;;  %v84_v31 = vsel %vm38_vm0, %v1647_v29, 0.0  ;;  %s1523_s27 = smov 48   ;;  %s1524_s28 = smov 104  }
   0x8   :  { %s1525_s0 = smov 72   ;;  %s1526_s29 = smov 40  }
   0xb   :  { %46 = vadd.xlane.f32.xlu0 %v45_v10  ;;  %70 = vadd.xlane.f32.xlu1 %v69_v11 }
   0xf   :  { %49 = vadd.xlane.f32.xlu0 %v48_v14  ;;  %73 = vadd.xlane.f32.xlu1 %v72_v15 }
  0x13   :  { %52 = vadd.xlane.f32.xlu0 %v51_v18  ;;  %76 = vadd.xlane.f32.xlu1 %v75_v19 }
  0x17   :  { %55 = vadd.xlane.f32.xlu0 %v54_v22  ;;  %79 = vadd.xlane.f32.xlu1 %v78_v23 }
  0x1b   :  { %58 = vadd.xlane.f32.xlu0 %v57_v26  ;;  %82 = vadd.xlane.f32.xlu1 %v81_v27 }
  0x1f   :  { %61 = vadd.xlane.f32.xlu0 %v60_v30  ;;  %85 = vadd.xlane.f32.xlu1 %v84_v31 }
  0x8c   :  { %v44_v32 = vpop.xlane.xlu1 %43  ;;  %v41_v33 = vpop.xlane.xlu0 %40 }
  0x8d   :  { %v89_v34 = vmul.f32 0.03125, %v44_v32  ;;  %v88_v35 = vmul.f32 0.03125, %v41_v33 }
  0x8f   :  { %v1653_v36 = vsub.f32 %v21_v0, %v89_v34  ;;  %v1655_v37 = vsub.f32 %v20_v1, %v88_v35 }
  0x90   :  { %v65_v38 = vpop.xlane.xlu0 %64  ;;  %v68_v39 = vpop.xlane.xlu1 %67 }
  0x91   :  { %v121_v40 = vmul.f32 %v1653_v36, %v1653_v36  ;;  %v120_v41 = vmul.f32 %v1655_v37, %v1655_v37  ;;  %v96_v0 = vmul.f32 0.03125, %v65_v38  ;;  %v97_v4 = vmul.f32 0.03125, %v68_v39  ;;  %v291_v38 = vld [vmem:[%s3000_s2 + $0x18] sm:$0xff] }
  0x92   :  { %1433 = vmatprep.subr.mxu0 %v291_v38  ;;  %1465 = vmatprep.subr.mxu1 %v291_v38 }
  0x93   :  { %v139_v42 = vsel %vm38_vm0, %v121_v40, 0.0  ;;  %v136_v43 = vsel %vm38_vm0, %v120_v41, 0.0  ;;  %v1683_v11 = vsub.f32 %v1571_v2, %v96_v0  ;;  %v1689_v15 = vsub.f32 %v1578_v5, %v97_v4  ;;  %1434 = vmatpush3.msra.mxu0 %v291_v38  ;;  %1469 = vmatpush3.msra.mxu1 %v291_v38 }
  0x94   :  { %140 = vadd.xlane.f32.xlu1 %v139_v42  ;;  %137 = vadd.xlane.f32.xlu0 %v136_v43  ;;  %v47_v44 = vpop.xlane.xlu0 %46  ;;  %v71_v45 = vpop.xlane.xlu1 %70 }
  0x95   :  { %v90_v46 = vmul.f32 0.03125, %v47_v44  ;;  %v98_v6 = vmul.f32 0.03125, %v71_v45  ;;  %v128_v5 = vmul.f32 %v1683_v11, %v1683_v11  ;;  %v129_v30 = vmul.f32 %v1689_v15, %v1689_v15  ;;  %v290_v45 = vld [vmem:[%s3000_s2 + $0x10] sm:$0xff] }
  0x96   :  { %1435 = vmatprep.subr.mxu0 %v290_v45  ;;  %1466 = vmatprep.subr.mxu1 %v290_v45 }
  0x97   :  { %v1663_v47 = vsub.f32 %v22_v8, %v90_v46  ;;  %v160_v35 = vsel %vm38_vm0, %v128_v5, 0.0  ;;  %1436 = vmatpush3.msra.mxu0 %v290_v45  ;;  %1470 = vmatpush3.msra.mxu1 %v290_v45 }
  0x98   :  { %v50_v48 = vpop.xlane.xlu0 %49  ;;  %v74_v49 = vpop.xlane.xlu1 %73 }
  0x99   :  { %v91_v50 = vmul.f32 0.03125, %v50_v48  ;;  %v122_v51 = vmul.f32 %v1663_v47, %v1663_v47  ;;  %v99_v18 = vmul.f32 0.03125, %v74_v49 }
  0x9b   :  { %v1667_v52 = vsub.f32 %v23_v12, %v91_v50  ;;  %v142_v53 = vsel %vm38_vm0, %v122_v51, 0.0  ;;  %v288_v51 = vld [vmem:[%s3000_s2] sm:$0xff] }
  0x9c   :  { %143 = vadd.xlane.f32.xlu0 %v142_v53  ;;  %v53_v54 = vpop.xlane.xlu0 %52  ;;  %v77_v55 = vpop.xlane.xlu1 %76 }
  0x9d   :  { %v92_v56 = vmul.f32 0.03125, %v53_v54  ;;  %v123_v57 = vmul.f32 %v1667_v52, %v1667_v52  ;;  %v100_v23 = vmul.f32 0.03125, %v77_v55 }
  0x9f   :  { %v1672_v58 = vsub.f32 %v24_v16, %v92_v56  ;;  %v145_v59 = vsel %vm38_vm0, %v123_v57, 0.0  ;;  %v1692_v16 = vsub.f32 %v1590_v9, %v98_v6  ;;  %v1703_v9 = vsub.f32 %v1601_v13, %v99_v18  ;;  %v1757_v18 = vld [vmem:[%s3001_s1] ss:$0 sm:$0xff] }
  0xa0   :  { %146 = vadd.xlane.f32.xlu1 %v145_v59  ;;  %v56_v60 = vpop.xlane.xlu0 %55  ;;  %v80_v63 = vpop.xlane.xlu1 %79  ;;  %v1710_v31 = vsub.f32 %v1612_v17, %v100_v23  ;;  %v163_v17 = vsel %vm38_vm0, %v129_v30, 0.0 }
  0xa1   :  { %v93_v61 = vmul.f32 0.03125, %v56_v60  ;;  %v124_v62 = vmul.f32 %v1672_v58, %v1672_v58  ;;  %v130_v27 = vmul.f32 %v1692_v16, %v1692_v16  ;;  %v131_v40 = vmul.f32 %v1703_v9, %v1703_v9 }
  0xa2   :  { %v132_v44 = vmul.f32 %v1710_v31, %v1710_v31 }
  0xa3   :  { %v1677_v1 = vsub.f32 %v25_v20, %v93_v61  ;;  %v148_v3 = vsel %vm38_vm0, %v124_v62, 0.0  ;;  %v166_v39 = vsel %vm38_vm0, %v130_v27, 0.0 }
  0xa4   :  { %149 = vadd.xlane.f32.xlu0 %v148_v3  ;;  %v59_v7 = vpop.xlane.xlu0 %58  ;;  %v83_v20 = vpop.xlane.xlu1 %82  ;;  %v172_v48 = vsel %vm38_vm0, %v132_v44, 0.0 }
  0xa5   :  { %v94_v8 = vmul.f32 0.03125, %v59_v7  ;;  %v125_v10 = vmul.f32 %v1677_v1, %v1677_v1  ;;  %v102_v33 = vmul.f32 0.03125, %v83_v20 }
  0xa7   :  { %v1685_v12 = vsub.f32 %v26_v24, %v94_v8  ;;  %v151_v14 = vsel %vm38_vm0, %v125_v10, 0.0  ;;  %v1727_v42 = vsub.f32 %v1634_v25, %v102_v33  ;;  %v169_v25 = vsel %vm38_vm0, %v131_v40, 0.0 }
  0xa8   :  { %152 = vadd.xlane.f32.xlu1 %v151_v14  ;;  %v62_v19 = vpop.xlane.xlu0 %61  ;;  %v86_v34 = vpop.xlane.xlu1 %85 }
  0xa9   :  { %v95_v22 = vmul.f32 0.03125, %v62_v19  ;;  %v126_v2 = vmul.f32 %v1685_v12, %v1685_v12  ;;  %v103_v43 = vmul.f32 0.03125, %v86_v34  ;;  %v134_v49 = vmul.f32 %v1727_v42, %v1727_v42 }
  0xab   :  { %v1697_v24 = vsub.f32 %v1642_v28, %v95_v22  ;;  %v154_v26 = vsel %vm38_vm0, %v126_v2, 0.0  ;;  %v101_v28 = vmul.f32 0.03125, %v80_v63  ;;  %v1739_v46 = vsub.f32 %v1647_v29, %v103_v43  ;;  %v1763_v2 = vld [vmem:[%s3001_s1 + $0x1] ss:$0 sm:$0xff] }
  0xac   :  { %155 = vadd.xlane.f32.xlu0 %v154_v26  ;;  %v178_v29 = vsel %vm38_vm0, %v134_v49, 0.0 }
  0xad   :  { %v127_v32 = vmul.f32 %v1697_v24, %v1697_v24  ;;  %v1724_v41 = vsub.f32 %v1623_v21, %v101_v28  ;;  %v289_v21 = vld [vmem:[%s3000_s2 + $0x8] sm:$0xff]  ;;  %v135_v54 = vmul.f32 %v1739_v46, %v1739_v46 }
  0xae   :  { %1437 = vmatprep.subr.mxu0 %v289_v21  ;;  %1467 = vmatprep.subr.mxu1 %v289_v21 }
  0xaf   :  { %v157_v13 = vsel %vm38_vm0, %v127_v32, 0.0  ;;  %v133_v50 = vmul.f32 %v1724_v41, %v1724_v41  ;;  %1438 = vmatpush3.msra.mxu0 %v289_v21  ;;  %1471 = vmatpush3.msra.mxu1 %v289_v21  ;;  %v181_v55 = vsel %vm38_vm0, %v135_v54, 0.0 }
  0xb0   :  { %161 = vadd.xlane.f32.xlu0 %v160_v35  ;;  %158 = vadd.xlane.f32.xlu1 %v157_v13 }
  0xb1   :  { %v175_v53 = vsel %vm38_vm0, %v133_v50, 0.0  ;;  %1439 = vmatprep.subr.mxu0 %v288_v51  ;;  %1468 = vmatprep.subr.mxu1 %v288_v51 }
  0xb2   :  { %1440 = vmatpush3.msra.mxu0 %v288_v51  ;;  %1472 = vmatpush3.msra.mxu1 %v288_v51 }
  0xb4   :  { %167 = vadd.xlane.f32.xlu0 %v166_v39  ;;  %164 = vadd.xlane.f32.xlu1 %v163_v17 }
  0xb8   :  { %173 = vadd.xlane.f32.xlu0 %v172_v48  ;;  %170 = vadd.xlane.f32.xlu1 %v169_v25 }
  0xbc   :  { %179 = vadd.xlane.f32.xlu0 %v178_v29  ;;  %176 = vadd.xlane.f32.xlu1 %v175_v53 }
  0xc0   :  { %182 = vadd.xlane.f32.xlu1 %v181_v55 }
 0x11d   :  { %v141_v56 = vpop.xlane.xlu1 %140  ;;  %v138_v57 = vpop.xlane.xlu0 %137 }
 0x11e   :  { %v185_v59 = vmul.f32 0.03125, %v141_v56  ;;  %v184_v60 = vmul.f32 0.03125, %v138_v57 }
 0x120   :  { %v201_v61 = vadd.f32 1e-05, %v185_v59  ;;  %v200_v62 = vadd.f32 1e-05, %v184_v60 }
 0x122   :  { %1484 = vrsqrt.f32 %v201_v61 }
 0x123   :  { %1486 = vrsqrt.f32 %v200_v62 }
 0x125   :  { %v144_v63 = vpop.xlane.xlu0 %143 }
 0x126   :  { %v186_v0 = vmul.f32 0.03125, %v144_v63 }
 0x128   :  { %v202_v3 = vadd.f32 1e-05, %v186_v0 }
 0x129   :  { %v147_v4 = vpop.xlane.xlu1 %146 }
 0x12a   :  { %1488 = vrsqrt.f32 %v202_v3  ;;  %v187_v6 = vmul.f32 0.03125, %v147_v4 }
 0x12c   :  { %v203_v7 = vadd.f32 1e-05, %v187_v6 }
 0x12d   :  { %v150_v8 = vpop.xlane.xlu0 %149 }
 0x12e   :  { %1490 = vrsqrt.f32 %v203_v7  ;;  %v188_v10 = vmul.f32 0.03125, %v150_v8 }
 0x12f   :  { %v1485_v14 = vpop.eup %1484 }
 0x130   :  { %v1487_v19 = vpop.eup %1486  ;;  %v204_v20 = vadd.f32 1e-05, %v188_v10  ;;  %v233_v22 = vmul.f32 %v1485_v14, %v1653_v36 }
 0x131   :  { %v153_v23 = vpop.xlane.xlu1 %152  ;;  %v232_v26 = vmul.f32 %v1487_v19, %v1655_v37 }
 0x132   :  { %1492 = vrsqrt.f32 %v204_v20  ;;  %v189_v5 = vmul.f32 0.03125, %v153_v23  ;;  %v253_v27 = vmul.f32 %v1757_v18, %v233_v22 }
 0x133   :  { %v252_v30 = vmul.f32 %v1757_v18, %v232_v26 }
 0x134   :  { %v205_v28 = vadd.f32 1e-05, %v189_v5  ;;  %v273_v32 = vadd.f32 %v1763_v2, %v253_v27 }
 0x135   :  { %v156_v33 = vpop.xlane.xlu0 %155  ;;  %v272_v36 = vadd.f32 %v1763_v2, %v252_v30 }
 0x136   :  { %1494 = vrsqrt.f32 %v205_v28  ;;  %v190_v34 = vmul.f32 0.03125, %v156_v33 }
 0x137   :  { %v1489_v35 = vpop.eup %1488  ;;  %1441 = vmatprep.mubr.msk.f32.mxu0 %vm38_vm0, %v272_v36 }
 0x138   :  { %v206_v13 = vadd.f32 1e-05, %v190_v34  ;;  %1442 = vmatmul.mubr.msk.f32.vlgmr.msra.gmra.mxu0 %vm38_vm0, %v273_v32  ;;  %v234_v37 = vmul.f32 %v1489_v35, %v1663_v47 }
 0x139   :  { %v159_v38 = vpop.xlane.xlu1 %158  ;;  %v162_v39 = vpop.xlane.xlu0 %161 }
 0x13a   :  { %1496 = vrsqrt.f32 %v206_v13  ;;  %v191_v17 = vmul.f32 0.03125, %v159_v38  ;;  %v192_v40 = vmul.f32 0.03125, %v162_v39  ;;  %v254_v43 = vmul.f32 %v1757_v18, %v234_v37 }
 0x13b   :  { %v1491_v44 = vpop.eup %1490 }
 0x13c   :  { %v207_v45 = vadd.f32 1e-05, %v191_v17  ;;  %v208_v21 = vadd.f32 1e-05, %v192_v40  ;;  %v274_v25 = vadd.f32 %v1763_v2, %v254_v43  ;;  %v235_v48 = vmul.f32 %v1491_v44, %v1667_v52 }
 0x13d   :  { %v165_v49 = vpop.xlane.xlu1 %164  ;;  %v168_v50 = vpop.xlane.xlu0 %167 }
 0x13e   :  { %1498 = vrsqrt.f32 %v207_v45  ;;  %v193_v51 = vmul.f32 0.03125, %v165_v49  ;;  %v194_v29 = vmul.f32 0.03125, %v168_v50  ;;  %1444 = vmatprep.mubr.msk.f32.mxu0 %vm38_vm0, %v274_v25  ;;  %v255_v47 = vmul.f32 %v1757_v18, %v235_v48 }
 0x13f   :  { %v1493_v53 = vpop.eup %1492  ;;  %1500 = vrsqrt.f32 %v208_v21 }
 0x140   :  { %v209_v54 = vadd.f32 1e-05, %v193_v51  ;;  %v210_v55 = vadd.f32 1e-05, %v194_v29  ;;  %v275_v56 = vadd.f32 %v1763_v2, %v255_v47  ;;  %v236_v57 = vmul.f32 %v1493_v53, %v1672_v58 }
 0x141   :  { %v171_v59 = vpop.xlane.xlu1 %170  ;;  %v174_v60 = vpop.xlane.xlu0 %173 }
 0x142   :  { %1502 = vrsqrt.f32 %v209_v54  ;;  %v195_v52 = vmul.f32 0.03125, %v171_v59  ;;  %v196_v61 = vmul.f32 0.03125, %v174_v60  ;;  %1445 = vmatmul.mubr.msk.f32.gmra.mxu0 %vm38_vm0, %v275_v56  ;;  %v256_v62 = vmul.f32 %v1757_v18, %v236_v57  ;;  %v1252_v59 = vld [vmem:[%s3002_s3] ss:$0 sm:$0xff] }
 0x143   :  { %v1495_v63 = vpop.eup %1494  ;;  %1504 = vrsqrt.f32 %v210_v55 }
 0x144   :  { %v211_v0 = vadd.f32 1e-05, %v195_v52  ;;  %v212_v3 = vadd.f32 1e-05, %v196_v61  ;;  %v276_v4 = vadd.f32 %v1763_v2, %v256_v62  ;;  %v237_v6 = vmul.f32 %v1495_v63, %v1677_v1 }
 0x145   :  { %v177_v7 = vpop.xlane.xlu1 %176  ;;  %v180_v8 = vpop.xlane.xlu0 %179 }
 0x146   :  { %1506 = vrsqrt.f32 %v211_v0  ;;  %v197_v58 = vmul.f32 0.03125, %v177_v7  ;;  %v198_v10 = vmul.f32 0.03125, %v180_v8  ;;  %1447 = vmatprep.mubr.msk.f32.mxu0 %vm38_vm0, %v276_v4  ;;  %v257_v14 = vmul.f32 %v1757_v18, %v237_v6 }
 0x147   :  { %v1497_v19 = vpop.eup %1496  ;;  %1508 = vrsqrt.f32 %v212_v3 }
 0x148   :  { %v213_v20 = vadd.f32 1e-05, %v197_v58  ;;  %v214_v22 = vadd.f32 1e-05, %v198_v10  ;;  %v277_v23 = vadd.f32 %v1763_v2, %v257_v14  ;;  %v238_v26 = vmul.f32 %v1497_v19, %v1685_v12 }
 0x149   :  { %v183_v5 = vpop.xlane.xlu1 %182 }
 0x14a   :  { %1510 = vrsqrt.f32 %v213_v20  ;;  %v199_v1 = vmul.f32 0.03125, %v183_v5  ;;  %1448 = vmatmul.mubr.msk.f32.gmra.mxu0 %vm38_vm0, %v277_v23  ;;  %v258_v27 = vmul.f32 %v1757_v18, %v238_v26 }
 0x14b   :  { %v1499_v30 = vpop.eup %1498  ;;  %1512 = vrsqrt.f32 %v214_v22 }
 0x14c   :  { %v1501_v28 = vpop.eup %1500  ;;  %v215_v32 = vadd.f32 1e-05, %v199_v1  ;;  %v278_v33 = vadd.f32 %v1763_v2, %v258_v27  ;;  %v239_v36 = vmul.f32 %v1499_v30, %v1697_v24 }
 0x14d   :  { %v240_v34 = vmul.f32 %v1501_v28, %v1683_v11 }
 0x14e   :  { %1514 = vrsqrt.f32 %v215_v32  ;;  %1450 = vmatprep.mubr.msk.f32.mxu0 %vm38_vm0, %v278_v33  ;;  %v259_v12 = vmul.f32 %v1757_v18, %v239_v36 }
 0x14f   :  { %v1503_v35 = vpop.eup %1502  ;;  %v260_v13 = vmul.f32 %v1757_v18, %v240_v34 }
 0x150   :  { %v1505_v37 = vpop.eup %1504  ;;  %v279_v38 = vadd.f32 %v1763_v2, %v259_v12  ;;  %v241_v39 = vmul.f32 %v1503_v35, %v1689_v15 }
 0x151   :  { %v280_v17 = vadd.f32 %v1763_v2, %v260_v13  ;;  %v242_v40 = vmul.f32 %v1505_v37, %v1692_v16 }
 0x152   :  { %1451 = vmatmul.mubr.msk.f32.gmra.mxu0 %vm38_vm0, %v279_v38  ;;  %v261_v11 = vmul.f32 %v1757_v18, %v241_v39 }
 0x153   :  { %v1507_v24 = vpop.eup %1506  ;;  %1453 = vmatprep.mubr.msk.f32.mxu1 %vm38_vm0, %v280_v17  ;;  %v262_v43 = vmul.f32 %v1757_v18, %v242_v40 }
 0x154   :  { %v1509_v44 = vpop.eup %1508  ;;  %v281_v45 = vadd.f32 %v1763_v2, %v261_v11  ;;  %v243_v21 = vmul.f32 %v1507_v24, %v1703_v9 }
 0x155   :  { %v282_v15 = vadd.f32 %v1763_v2, %v262_v43  ;;  %v244_v25 = vmul.f32 %v1509_v44, %v1710_v31 }
 0x156   :  { %1454 = vmatmul.mubr.msk.f32.vlgmr.msra.gmra.mxu1 %vm38_vm0, %v281_v45  ;;  %v263_v16 = vmul.f32 %v1757_v18, %v243_v21 }
 0x157   :  { %v1511_v48 = vpop.eup %1510  ;;  %1456 = vmatprep.mubr.msk.f32.mxu1 %vm38_vm0, %v282_v15  ;;  %v264_v49 = vmul.f32 %v1757_v18, %v244_v25 }
 0x158   :  { %v1513_v50 = vpop.eup %1512  ;;  %v283_v51 = vadd.f32 %v1763_v2, %v263_v16  ;;  %v245_v29 = vmul.f32 %v1511_v48, %v1724_v41 }
 0x159   :  { %v284_v9 = vadd.f32 %v1763_v2, %v264_v49  ;;  %v246_v47 = vmul.f32 %v1513_v50, %v1727_v42 }
 0x15a   :  { %1457 = vmatmul.mubr.msk.f32.gmra.mxu1 %vm38_vm0, %v283_v51  ;;  %v265_v31 = vmul.f32 %v1757_v18, %v245_v29 }
 0x15b   :  { %v1515_v53 = vpop.eup %1514  ;;  %1459 = vmatprep.mubr.msk.f32.mxu1 %vm38_vm0, %v284_v9  ;;  %v266_v54 = vmul.f32 %v1757_v18, %v246_v47 }
 0x15c   :  { %v285_v55 = vadd.f32 %v1763_v2, %v265_v31  ;;  %v247_v56 = vmul.f32 %v1515_v53, %v1739_v46 }
 0x15d   :  { %v286_v57 = vadd.f32 %v1763_v2, %v266_v54 }
 0x15e   :  { %1460 = vmatmul.mubr.msk.f32.gmra.mxu1 %vm38_vm0, %v285_v55  ;;  %v267_v41 = vmul.f32 %v1757_v18, %v247_v56 }
 0x15f   :  { %1462 = vmatprep.mubr.msk.f32.mxu1 %vm38_vm0, %v286_v57 }
 0x160   :  { %v287_v42 = vadd.f32 %v1763_v2, %v267_v41 }
 0x162   :  { %1463 = vmatmul.mubr.msk.f32.gmra.mxu1 %vm38_vm0, %v287_v42 }
 0x1f8   :  { %v1443_v60 = vpop.f32.mrf.mxu0 }
 0x1f9   :  { %v1831_v52 = vadd.f32 %v1443_v60, %v1252_v59 }
 0x1fa   :  { %v413_v46 = vpop.f32.mrf.mxu0 }
 0x1fb   :  { %494 = vst.msk [vmem:[%s3003_s4 + $0x8] sm:$0xff] %vm492_vm1, %v1831_v52  ;;  %v1838_v18 = vadd.f32 %v1252_v59, %v413_v46  ;;  %527 = vrot.lane.b32.xlu1 %v1831_v52, %s1516_s18 }
 0x1fd   :  { %493 = vst.msk [vmem:[%s3003_s4] sm:$0xff] %vm492_vm1, %v1838_v18  ;;  %525 = vrot.lane.b32.xlu0 %v1838_v18, %s1516_s18 }
 0x202   :  { %v1446_v2 = vpop.f32.mrf.mxu0 }
 0x203   :  { %v1849_v61 = vadd.f32 %v1446_v2, %v1252_v59 }
 0x204   :  { %v423_v62 = vpop.f32.mrf.mxu0 }
 0x205   :  { %496 = vst.msk [vmem:[%s3003_s4 + $0x18] sm:$0xff] %vm492_vm1, %v1849_v61  ;;  %v1856_v63 = vadd.f32 %v1252_v59, %v423_v62 }
 0x207   :  { %495 = vst.msk [vmem:[%s3003_s4 + $0x10] sm:$0xff] %vm492_vm1, %v1856_v63 }
 0x20a   :  { %v1449_v0 = vpop.f32.mrf.mxu0 }
 0x20b   :  { %v1863_v3 = vadd.f32 %v1449_v0, %v1252_v59 }
 0x20c   :  { %v433_v4 = vpop.f32.mrf.mxu0 }
 0x20d   :  { %498 = vst.msk [vmem:[%s3003_s4 + $0x28] sm:$0xff] %vm492_vm1, %v1863_v3  ;;  %v1870_v6 = vadd.f32 %v1252_v59, %v433_v4 }
 0x20f   :  { %497 = vst.msk [vmem:[%s3003_s4 + $0x20] sm:$0xff] %vm492_vm1, %v1870_v6 }
 0x212   :  { %v1452_v7 = vpop.f32.mrf.mxu0 }
 0x213   :  { %v1877_v8 = vadd.f32 %v1452_v7, %v1252_v59 }
 0x214   :  { %v443_v58 = vpop.f32.mrf.mxu0 }
 0x215   :  { %500 = vst.msk [vmem:[%s3003_s4 + $0x38] sm:$0xff] %vm492_vm1, %v1877_v8  ;;  %v1884_v10 = vadd.f32 %v1252_v59, %v443_v58 }
 0x216   :  { %v1455_v14 = vpop.f32.mrf.mxu1 }
 0x217   :  { %499 = vst.msk [vmem:[%s3003_s4 + $0x30] sm:$0xff] %vm492_vm1, %v1884_v10  ;;  %v1891_v19 = vadd.f32 %v1455_v14, %v1252_v59 }
 0x218   :  { %v453_v20 = vpop.f32.mrf.mxu1 }
 0x219   :  { %502 = vst.msk [vmem:[%s3003_s4 + $0x48] sm:$0xff] %vm492_vm1, %v1891_v19  ;;  %v1898_v22 = vadd.f32 %v1252_v59, %v453_v20  ;;  %543 = vrot.lane.b32.xlu1 %v1891_v19, %s1516_s18 }
 0x21a   :  { %v1458_v23 = vpop.f32.mrf.mxu1 }
 0x21b   :  { %501 = vst.msk [vmem:[%s3003_s4 + $0x40] sm:$0xff] %vm492_vm1, %v1898_v22  ;;  %v1907_v26 = vadd.f32 %v1458_v23, %v1252_v59  ;;  %541 = vrot.lane.b32.xlu0 %v1898_v22, %s1516_s18 }
 0x21c   :  { %v463_v5 = vpop.f32.mrf.mxu1 }
 0x21d   :  { %504 = vst.msk [vmem:[%s3003_s4 + $0x58] sm:$0xff] %vm492_vm1, %v1907_v26  ;;  %v1916_v1 = vadd.f32 %v1252_v59, %v463_v5  ;;  %591 = vrot.lane.b32.xlu1 %v1831_v52, %s1517_s12 }
 0x21e   :  { %v1461_v27 = vpop.f32.mrf.mxu1 }
 0x21f   :  { %503 = vst.msk [vmem:[%s3003_s4 + $0x50] sm:$0xff] %vm492_vm1, %v1916_v1  ;;  %v1925_v30 = vadd.f32 %v1461_v27, %v1252_v59  ;;  %589 = vrot.lane.b32.xlu0 %v1838_v18, %s1517_s12 }
 0x220   :  { %v473_v28 = vpop.f32.mrf.mxu1 }
 0x221   :  { %506 = vst.msk [vmem:[%s3003_s4 + $0x68] sm:$0xff] %vm492_vm1, %v1925_v30  ;;  %v1934_v32 = vadd.f32 %v1252_v59, %v473_v28  ;;  %607 = vrot.lane.b32.xlu1 %v1891_v19, %s1517_s12 }
 0x222   :  { %v1464_v33 = vpop.f32.mrf.mxu1 }
 0x223   :  { %505 = vst.msk [vmem:[%s3003_s4 + $0x60] sm:$0xff] %vm492_vm1, %v1934_v32  ;;  %v1943_v36 = vadd.f32 %v1464_v33, %v1252_v59  ;;  %605 = vrot.lane.b32.xlu0 %v1898_v22, %s1517_s12 }
 0x224   :  { %v483_v34 = vpop.f32.mrf.mxu1 }
 0x225   :  { %508 = vst.msk [vmem:[%s3003_s4 + $0x78] sm:$0xff] %vm492_vm1, %v1943_v36  ;;  %v1952_v12 = vadd.f32 %v1252_v59, %v483_v34  ;;  %655 = vrot.lane.b32.xlu1 %v1831_v52, %s1518_s20 }
 0x227   :  { %507 = vst.msk [vmem:[%s3003_s4 + $0x70] sm:$0xff] %vm492_vm1, %v1952_v12  ;;  %653 = vrot.lane.b32.xlu0 %v1838_v18, %s1518_s20 }
 0x229   :  { %671 = vrot.lane.b32.xlu1 %v1891_v19, %s1518_s20 }
 0x22b   :  { %669 = vrot.lane.b32.xlu0 %v1898_v22, %s1518_s20 }
 0x22d   :  { %720 = vrot.lane.b32.xlu1 %v1831_v52, %s1519_s23 }
 0x22f   :  { %718 = vrot.lane.b32.xlu0 %v1838_v18, %s1519_s23 }
 0x231   :  { %736 = vrot.lane.b32.xlu1 %v1891_v19, %s1519_s23 }
 0x233   :  { %734 = vrot.lane.b32.xlu0 %v1898_v22, %s1519_s23 }
 0x235   :  { %785 = vrot.lane.b32.xlu1 %v1831_v52, %s1520_s24 }
 0x237   :  { %783 = vrot.lane.b32.xlu0 %v1838_v18, %s1520_s24 }
 0x239   :  { %801 = vrot.lane.b32.xlu1 %v1891_v19, %s1520_s24 }
 0x23b   :  { %799 = vrot.lane.b32.xlu0 %v1898_v22, %s1520_s24 }
 0x23d   :  { %850 = vrot.lane.b32.xlu1 %v1831_v52, %s1521_s25 }
 0x23f   :  { %848 = vrot.lane.b32.xlu0 %v1838_v18, %s1521_s25 }
 0x241   :  { %866 = vrot.lane.b32.xlu1 %v1891_v19, %s1521_s25 }
 0x243   :  { %864 = vrot.lane.b32.xlu0 %v1898_v22, %s1521_s25 }
 0x245   :  { %915 = vrot.lane.b32.xlu1 %v1831_v52, %s1522_s26 }
 0x247   :  { %913 = vrot.lane.b32.xlu0 %v1838_v18, %s1522_s26 }
 0x249   :  { %931 = vrot.lane.b32.xlu1 %v1891_v19, %s1522_s26 }
 0x24b   :  { %929 = vrot.lane.b32.xlu0 %v1898_v22, %s1522_s26 }
 0x24d   :  { %980 = vrot.lane.b32.xlu1 %v1831_v52, %s1523_s27 }
 0x24f   :  { %978 = vrot.lane.b32.xlu0 %v1838_v18, %s1523_s27 }
 0x251   :  { %996 = vrot.lane.b32.xlu1 %v1891_v19, %s1523_s27 }
 0x253   :  { %994 = vrot.lane.b32.xlu0 %v1898_v22, %s1523_s27 }
 0x255   :  { %1045 = vrot.lane.b32.xlu1 %v1831_v52, %s1524_s28 }
 0x257   :  { %1043 = vrot.lane.b32.xlu0 %v1838_v18, %s1524_s28 }
 0x259   :  { %1061 = vrot.lane.b32.xlu1 %v1891_v19, %s1524_s28 }
 0x25b   :  { %1059 = vrot.lane.b32.xlu0 %v1898_v22, %s1524_s28 }
 0x25d   :  { %1110 = vrot.lane.b32.xlu1 %v1831_v52, %s1525_s0 }
 0x25f   :  { %1108 = vrot.lane.b32.xlu0 %v1838_v18, %s1525_s0 }
 0x261   :  { %1126 = vrot.lane.b32.xlu1 %v1891_v19, %s1525_s0 }
 0x263   :  { %1124 = vrot.lane.b32.xlu0 %v1898_v22, %s1525_s0 }
 0x265   :  { %1175 = vrot.lane.b32.xlu1 %v1831_v52, %s1526_s29 }
 0x267   :  { %1173 = vrot.lane.b32.xlu0 %v1838_v18, %s1526_s29 }
 0x269   :  { %1191 = vrot.lane.b32.xlu1 %v1891_v19, %s1526_s29 }
 0x26b   :  { %1189 = vrot.lane.b32.xlu0 %v1898_v22, %s1526_s29 }
 0x26d   :  { %v528_v35 = vpop.permute.xlu1 %527  ;;  %531 = vrot.lane.b32.xlu1 %v1849_v61, %s1516_s18 }
 0x26e   :  { %574 = vst.msk [vmem:[%s3004_s5 + $0x8] sm:$0xff] %vm492_vm1, %v528_v35 }
 0x26f   :  { %v526_v13 = vpop.permute.xlu0 %525  ;;  %545 = vrot.lane.b32.xlu0 %v1916_v1, %s1516_s18 }
 0x270   :  { %573 = vst.msk [vmem:[%s3004_s5] sm:$0xff] %vm492_vm1, %v526_v13 }
 0x271   :  { %547 = vrot.lane.b32.xlu1 %v1907_v26, %s1516_s18 }
 0x273   :  { %593 = vrot.lane.b32.xlu0 %v1856_v63, %s1517_s12 }
 0x275   :  { %595 = vrot.lane.b32.xlu1 %v1849_v61, %s1517_s12 }
 0x277   :  { %609 = vrot.lane.b32.xlu0 %v1916_v1, %s1517_s12 }
 0x279   :  { %611 = vrot.lane.b32.xlu1 %v1907_v26, %s1517_s12 }
 0x27b   :  { %657 = vrot.lane.b32.xlu0 %v1856_v63, %s1518_s20 }
 0x27d   :  { %659 = vrot.lane.b32.xlu1 %v1849_v61, %s1518_s20 }
 0x27f   :  { %673 = vrot.lane.b32.xlu0 %v1916_v1, %s1518_s20 }
 0x281   :  { %675 = vrot.lane.b32.xlu1 %v1907_v26, %s1518_s20 }
 0x283   :  { %722 = vrot.lane.b32.xlu0 %v1856_v63, %s1519_s23 }
 0x285   :  { %724 = vrot.lane.b32.xlu1 %v1849_v61, %s1519_s23 }
 0x287   :  { %738 = vrot.lane.b32.xlu0 %v1916_v1, %s1519_s23 }
 0x289   :  { %740 = vrot.lane.b32.xlu1 %v1907_v26, %s1519_s23 }
 0x28b   :  { %v544_v37 = vpop.permute.xlu1 %543  ;;  %787 = vrot.lane.b32.xlu0 %v1856_v63, %s1520_s24 }
 0x28c   :  { %582 = vst.msk [vmem:[%s3004_s5 + $0x48] sm:$0xff] %vm492_vm1, %v544_v37 }
 0x28d   :  { %789 = vrot.lane.b32.xlu1 %v1849_v61, %s1520_s24  ;;  %v542_v38 = vpop.permute.xlu0 %541 }
 0x28e   :  { %581 = vst.msk [vmem:[%s3004_s5 + $0x40] sm:$0xff] %vm492_vm1, %v542_v38 }
 0x28f   :  { %v592_v39 = vpop.permute.xlu1 %591  ;;  %803 = vrot.lane.b32.xlu0 %v1916_v1, %s1520_s24 }
 0x290   :  { %638 = vst.msk [vmem:[%s3005_s6 + $0x8] sm:$0xff] %vm492_vm1, %v592_v39 }
 0x291   :  { %805 = vrot.lane.b32.xlu1 %v1907_v26, %s1520_s24  ;;  %v590_v17 = vpop.permute.xlu0 %589 }
 0x292   :  { %637 = vst.msk [vmem:[%s3005_s6] sm:$0xff] %vm492_vm1, %v590_v17 }
 0x293   :  { %v608_v40 = vpop.permute.xlu1 %607  ;;  %852 = vrot.lane.b32.xlu0 %v1856_v63, %s1521_s25 }
 0x294   :  { %646 = vst.msk [vmem:[%s3005_s6 + $0x48] sm:$0xff] %vm492_vm1, %v608_v40 }
 0x295   :  { %854 = vrot.lane.b32.xlu1 %v1849_v61, %s1521_s25  ;;  %v606_v11 = vpop.permute.xlu0 %605 }
 0x296   :  { %645 = vst.msk [vmem:[%s3005_s6 + $0x40] sm:$0xff] %vm492_vm1, %v606_v11 }
 0x297   :  { %v656_v24 = vpop.permute.xlu1 %655  ;;  %868 = vrot.lane.b32.xlu0 %v1916_v1, %s1521_s25 }
 0x298   :  { %1270 = vst.msk [vmem:[%s3003_s4 + $0x88] sm:$0xff] %vm492_vm1, %v656_v24 }
 0x299   :  { %870 = vrot.lane.b32.xlu1 %v1907_v26, %s1521_s25  ;;  %v654_v43 = vpop.permute.xlu0 %653 }
 0x29a   :  { %1269 = vst.msk [vmem:[%s3003_s4 + $0x80] sm:$0xff] %vm492_vm1, %v654_v43 }
 0x29b   :  { %v672_v44 = vpop.permute.xlu1 %671  ;;  %917 = vrot.lane.b32.xlu0 %v1856_v63, %s1522_s26 }
 0x29c   :  { %1278 = vst.msk [vmem:[%s3003_s4 + $0xc8] sm:$0xff] %vm492_vm1, %v672_v44 }
 0x29d   :  { %919 = vrot.lane.b32.xlu1 %v1849_v61, %s1522_s26  ;;  %v670_v45 = vpop.permute.xlu0 %669 }
 0x29e   :  { %1277 = vst.msk [vmem:[%s3003_s4 + $0xc0] sm:$0xff] %vm492_vm1, %v670_v45 }
 0x29f   :  { %v721_v21 = vpop.permute.xlu1 %720  ;;  %933 = vrot.lane.b32.xlu0 %v1916_v1, %s1522_s26 }
 0x2a0   :  { %1286 = vst.msk [vmem:[%s3004_s5 + $0x88] sm:$0xff] %vm492_vm1, %v721_v21 }
 0x2a1   :  { %935 = vrot.lane.b32.xlu1 %v1907_v26, %s1522_s26  ;;  %v719_v15 = vpop.permute.xlu0 %718 }
 0x2a2   :  { %1285 = vst.msk [vmem:[%s3004_s5 + $0x80] sm:$0xff] %vm492_vm1, %v719_v15 }
 0x2a3   :  { %v737_v25 = vpop.permute.xlu1 %736  ;;  %982 = vrot.lane.b32.xlu0 %v1856_v63, %s1523_s27 }
 0x2a4   :  { %1294 = vst.msk [vmem:[%s3004_s5 + $0xc8] sm:$0xff] %vm492_vm1, %v737_v25 }
 0x2a5   :  { %984 = vrot.lane.b32.xlu1 %v1849_v61, %s1523_s27  ;;  %v735_v16 = vpop.permute.xlu0 %734 }
 0x2a6   :  { %1293 = vst.msk [vmem:[%s3004_s5 + $0xc0] sm:$0xff] %vm492_vm1, %v735_v16 }
 0x2a7   :  { %v786_v48 = vpop.permute.xlu1 %785  ;;  %998 = vrot.lane.b32.xlu0 %v1916_v1, %s1523_s27 }
 0x2a8   :  { %1302 = vst.msk [vmem:[%s3005_s6 + $0x88] sm:$0xff] %vm492_vm1, %v786_v48 }
 0x2a9   :  { %1000 = vrot.lane.b32.xlu1 %v1907_v26, %s1523_s27  ;;  %v784_v49 = vpop.permute.xlu0 %783 }
 0x2aa   :  { %1301 = vst.msk [vmem:[%s3005_s6 + $0x80] sm:$0xff] %vm492_vm1, %v784_v49 }
 0x2ab   :  { %v802_v50 = vpop.permute.xlu1 %801  ;;  %1047 = vrot.lane.b32.xlu0 %v1856_v63, %s1524_s28 }
 0x2ac   :  { %1310 = vst.msk [vmem:[%s3005_s6 + $0xc8] sm:$0xff] %vm492_vm1, %v802_v50 }
 0x2ad   :  { %1049 = vrot.lane.b32.xlu1 %v1849_v61, %s1524_s28  ;;  %v800_v51 = vpop.permute.xlu0 %799 }
 0x2ae   :  { %1309 = vst.msk [vmem:[%s3005_s6 + $0xc0] sm:$0xff] %vm492_vm1, %v800_v51 }
 0x2af   :  { %v851_v29 = vpop.permute.xlu1 %850  ;;  %1063 = vrot.lane.b32.xlu0 %v1916_v1, %s1524_s28 }
 0x2b0   :  { %1318 = vst.msk [vmem:[%s3003_s4 + $0x108] sm:$0xff] %vm492_vm1, %v851_v29 }
 0x2b1   :  { %1065 = vrot.lane.b32.xlu1 %v1907_v26, %s1524_s28  ;;  %v849_v9 = vpop.permute.xlu0 %848 }
 0x2b2   :  { %1317 = vst.msk [vmem:[%s3003_s4 + $0x100] sm:$0xff] %vm492_vm1, %v849_v9 }
 0x2b3   :  { %v867_v47 = vpop.permute.xlu1 %866  ;;  %1112 = vrot.lane.b32.xlu0 %v1856_v63, %s1525_s0 }
 0x2b4   :  { %1326 = vst.msk [vmem:[%s3003_s4 + $0x148] sm:$0xff] %vm492_vm1, %v867_v47 }
 0x2b5   :  { %1114 = vrot.lane.b32.xlu1 %v1849_v61, %s1525_s0  ;;  %v865_v31 = vpop.permute.xlu0 %864 }
 0x2b6   :  { %1325 = vst.msk [vmem:[%s3003_s4 + $0x140] sm:$0xff] %vm492_vm1, %v865_v31 }
 0x2b7   :  { %v916_v53 = vpop.permute.xlu1 %915  ;;  %1128 = vrot.lane.b32.xlu0 %v1916_v1, %s1525_s0 }
 0x2b8   :  { %1334 = vst.msk [vmem:[%s3004_s5 + $0x108] sm:$0xff] %vm492_vm1, %v916_v53 }
 0x2b9   :  { %1130 = vrot.lane.b32.xlu1 %v1907_v26, %s1525_s0  ;;  %v914_v54 = vpop.permute.xlu0 %913 }
 0x2ba   :  { %1333 = vst.msk [vmem:[%s3004_s5 + $0x100] sm:$0xff] %vm492_vm1, %v914_v54 }
 0x2bb   :  { %v932_v55 = vpop.permute.xlu1 %931  ;;  %1177 = vrot.lane.b32.xlu0 %v1856_v63, %s1526_s29 }
 0x2bc   :  { %1342 = vst.msk [vmem:[%s3004_s5 + $0x148] sm:$0xff] %vm492_vm1, %v932_v55 }
 0x2bd   :  { %1179 = vrot.lane.b32.xlu1 %v1849_v61, %s1526_s29  ;;  %v930_v56 = vpop.permute.xlu0 %929 }
 0x2be   :  { %1341 = vst.msk [vmem:[%s3004_s5 + $0x140] sm:$0xff] %vm492_vm1, %v930_v56 }
 0x2bf   :  { %v981_v57 = vpop.permute.xlu1 %980  ;;  %1193 = vrot.lane.b32.xlu0 %v1916_v1, %s1526_s29 }
 0x2c0   :  { %1350 = vst.msk [vmem:[%s3005_s6 + $0x108] sm:$0xff] %vm492_vm1, %v981_v57 }
 0x2c1   :  { %1195 = vrot.lane.b32.xlu1 %v1907_v26, %s1526_s29  ;;  %v979_v41 = vpop.permute.xlu0 %978 }
 0x2c2   :  { %1349 = vst.msk [vmem:[%s3005_s6 + $0x100] sm:$0xff] %vm492_vm1, %v979_v41 }
 0x2c3   :  { %v997_v42 = vpop.permute.xlu1 %996  ;;  %533 = vrot.lane.b32.xlu0 %v1870_v6, %s1516_s18 }
 0x2c4   :  { %1358 = vst.msk [vmem:[%s3005_s6 + $0x148] sm:$0xff] %vm492_vm1, %v997_v42 }
 0x2c5   :  { %529 = vrot.lane.b32.xlu1 %v1856_v63, %s1516_s18  ;;  %v995_v59 = vpop.permute.xlu0 %994 }
 0x2c6   :  { %1357 = vst.msk [vmem:[%s3005_s6 + $0x140] sm:$0xff] %vm492_vm1, %v995_v59 }
 0x2c7   :  { %v1046_v60 = vpop.permute.xlu1 %1045  ;;  %549 = vrot.lane.b32.xlu0 %v1934_v32, %s1516_s18 }
 0x2c8   :  { %1366 = vst.msk [vmem:[%s3003_s4 + $0x188] sm:$0xff] %vm492_vm1, %v1046_v60 }
 0x2c9   :  { %535 = vrot.lane.b32.xlu1 %v1863_v3, %s1516_s18  ;;  %v1044_v52 = vpop.permute.xlu0 %1043 }
 0x2ca   :  { %1365 = vst.msk [vmem:[%s3003_s4 + $0x180] sm:$0xff] %vm492_vm1, %v1044_v52 }
 0x2cb   :  { %v1062_v46 = vpop.permute.xlu1 %1061  ;;  %597 = vrot.lane.b32.xlu0 %v1870_v6, %s1517_s12 }
 0x2cc   :  { %1374 = vst.msk [vmem:[%s3003_s4 + $0x1c8] sm:$0xff] %vm492_vm1, %v1062_v46 }
 0x2cd   :  { %551 = vrot.lane.b32.xlu1 %v1925_v30, %s1516_s18  ;;  %v1060_v18 = vpop.permute.xlu0 %1059 }
 0x2ce   :  { %1373 = vst.msk [vmem:[%s3003_s4 + $0x1c0] sm:$0xff] %vm492_vm1, %v1060_v18 }
 0x2cf   :  { %v1111_v2 = vpop.permute.xlu1 %1110  ;;  %613 = vrot.lane.b32.xlu0 %v1934_v32, %s1517_s12 }
 0x2d0   :  { %1382 = vst.msk [vmem:[%s3004_s5 + $0x188] sm:$0xff] %vm492_vm1, %v1111_v2 }
 0x2d1   :  { %599 = vrot.lane.b32.xlu1 %v1863_v3, %s1517_s12  ;;  %v1109_v61 = vpop.permute.xlu0 %1108 }
 0x2d2   :  { %1381 = vst.msk [vmem:[%s3004_s5 + $0x180] sm:$0xff] %vm492_vm1, %v1109_v61 }
 0x2d3   :  { %v1127_v62 = vpop.permute.xlu1 %1126  ;;  %661 = vrot.lane.b32.xlu0 %v1870_v6, %s1518_s20 }
 0x2d4   :  { %1390 = vst.msk [vmem:[%s3004_s5 + $0x1c8] sm:$0xff] %vm492_vm1, %v1127_v62 }
 0x2d5   :  { %615 = vrot.lane.b32.xlu1 %v1925_v30, %s1517_s12  ;;  %v1125_v63 = vpop.permute.xlu0 %1124 }
 0x2d6   :  { %1389 = vst.msk [vmem:[%s3004_s5 + $0x1c0] sm:$0xff] %vm492_vm1, %v1125_v63 }
 0x2d7   :  { %v1176_v0 = vpop.permute.xlu1 %1175  ;;  %677 = vrot.lane.b32.xlu0 %v1934_v32, %s1518_s20 }
 0x2d8   :  { %1398 = vst.msk [vmem:[%s3005_s6 + $0x188] sm:$0xff] %vm492_vm1, %v1176_v0 }
 0x2d9   :  { %663 = vrot.lane.b32.xlu1 %v1863_v3, %s1518_s20  ;;  %v1174_v4 = vpop.permute.xlu0 %1173 }
 0x2da   :  { %1397 = vst.msk [vmem:[%s3005_s6 + $0x180] sm:$0xff] %vm492_vm1, %v1174_v4 }
 0x2db   :  { %v1192_v7 = vpop.permute.xlu1 %1191  ;;  %726 = vrot.lane.b32.xlu0 %v1870_v6, %s1519_s23 }
 0x2dc   :  { %1406 = vst.msk [vmem:[%s3005_s6 + $0x1c8] sm:$0xff] %vm492_vm1, %v1192_v7 }
 0x2dd   :  { %679 = vrot.lane.b32.xlu1 %v1925_v30, %s1518_s20  ;;  %v1190_v58 = vpop.permute.xlu0 %1189 }
 0x2de   :  { %1405 = vst.msk [vmem:[%s3005_s6 + $0x1c0] sm:$0xff] %vm492_vm1, %v1190_v58 }
 0x2df   :  { %v532_v14 = vpop.permute.xlu1 %531  ;;  %742 = vrot.lane.b32.xlu0 %v1934_v32, %s1519_s23 }
 0x2e0   :  { %576 = vst.msk [vmem:[%s3004_s5 + $0x18] sm:$0xff] %vm492_vm1, %v532_v14 }
 0x2e1   :  { %728 = vrot.lane.b32.xlu1 %v1863_v3, %s1519_s23  ;;  %v546_v19 = vpop.permute.xlu0 %545 }
 0x2e2   :  { %583 = vst.msk [vmem:[%s3004_s5 + $0x50] sm:$0xff] %vm492_vm1, %v546_v19 }
 0x2e3   :  { %v548_v20 = vpop.permute.xlu1 %547  ;;  %791 = vrot.lane.b32.xlu0 %v1870_v6, %s1520_s24 }
 0x2e4   :  { %584 = vst.msk [vmem:[%s3004_s5 + $0x58] sm:$0xff] %vm492_vm1, %v548_v20 }
 0x2e5   :  { %744 = vrot.lane.b32.xlu1 %v1925_v30, %s1519_s23  ;;  %v594_v22 = vpop.permute.xlu0 %593 }
 0x2e6   :  { %639 = vst.msk [vmem:[%s3005_s6 + $0x10] sm:$0xff] %vm492_vm1, %v594_v22 }
 0x2e7   :  { %v596_v23 = vpop.permute.xlu1 %595  ;;  %807 = vrot.lane.b32.xlu0 %v1934_v32, %s1520_s24 }
 0x2e8   :  { %640 = vst.msk [vmem:[%s3005_s6 + $0x18] sm:$0xff] %vm492_vm1, %v596_v23 }
 0x2e9   :  { %793 = vrot.lane.b32.xlu1 %v1863_v3, %s1520_s24  ;;  %v610_v26 = vpop.permute.xlu0 %609 }
 0x2ea   :  { %647 = vst.msk [vmem:[%s3005_s6 + $0x50] sm:$0xff] %vm492_vm1, %v610_v26 }
 0x2eb   :  { %v612_v5 = vpop.permute.xlu1 %611  ;;  %856 = vrot.lane.b32.xlu0 %v1870_v6, %s1521_s25 }
 0x2ec   :  { %648 = vst.msk [vmem:[%s3005_s6 + $0x58] sm:$0xff] %vm492_vm1, %v612_v5 }
 0x2ed   :  { %809 = vrot.lane.b32.xlu1 %v1925_v30, %s1520_s24  ;;  %v658_v1 = vpop.permute.xlu0 %657 }
 0x2ee   :  { %1271 = vst.msk [vmem:[%s3003_s4 + $0x90] sm:$0xff] %vm492_vm1, %v658_v1 }
 0x2ef   :  { %v660_v27 = vpop.permute.xlu1 %659  ;;  %872 = vrot.lane.b32.xlu0 %v1934_v32, %s1521_s25 }
 0x2f0   :  { %1272 = vst.msk [vmem:[%s3003_s4 + $0x98] sm:$0xff] %vm492_vm1, %v660_v27 }
 0x2f1   :  { %858 = vrot.lane.b32.xlu1 %v1863_v3, %s1521_s25  ;;  %v674_v28 = vpop.permute.xlu0 %673 }
 0x2f2   :  { %1279 = vst.msk [vmem:[%s3003_s4 + $0xd0] sm:$0xff] %vm492_vm1, %v674_v28 }
 0x2f3   :  { %v676_v33 = vpop.permute.xlu1 %675  ;;  %921 = vrot.lane.b32.xlu0 %v1870_v6, %s1522_s26 }
 0x2f4   :  { %1280 = vst.msk [vmem:[%s3003_s4 + $0xd8] sm:$0xff] %vm492_vm1, %v676_v33 }
 0x2f5   :  { %874 = vrot.lane.b32.xlu1 %v1925_v30, %s1521_s25  ;;  %v723_v34 = vpop.permute.xlu0 %722 }
 0x2f6   :  { %1287 = vst.msk [vmem:[%s3004_s5 + $0x90] sm:$0xff] %vm492_vm1, %v723_v34 }
 0x2f7   :  { %v725_v35 = vpop.permute.xlu1 %724  ;;  %937 = vrot.lane.b32.xlu0 %v1934_v32, %s1522_s26 }
 0x2f8   :  { %1288 = vst.msk [vmem:[%s3004_s5 + $0x98] sm:$0xff] %vm492_vm1, %v725_v35 }
 0x2f9   :  { %923 = vrot.lane.b32.xlu1 %v1863_v3, %s1522_s26  ;;  %v739_v13 = vpop.permute.xlu0 %738 }
 0x2fa   :  { %1295 = vst.msk [vmem:[%s3004_s5 + $0xd0] sm:$0xff] %vm492_vm1, %v739_v13 }
 0x2fb   :  { %v741_v37 = vpop.permute.xlu1 %740  ;;  %986 = vrot.lane.b32.xlu0 %v1870_v6, %s1523_s27 }
 0x2fc   :  { %1296 = vst.msk [vmem:[%s3004_s5 + $0xd8] sm:$0xff] %vm492_vm1, %v741_v37 }
 0x2fd   :  { %939 = vrot.lane.b32.xlu1 %v1925_v30, %s1522_s26  ;;  %v788_v38 = vpop.permute.xlu0 %787 }
 0x2fe   :  { %1303 = vst.msk [vmem:[%s3005_s6 + $0x90] sm:$0xff] %vm492_vm1, %v788_v38 }
 0x2ff   :  { %v790_v39 = vpop.permute.xlu1 %789  ;;  %1002 = vrot.lane.b32.xlu0 %v1934_v32, %s1523_s27 }
 0x300   :  { %1304 = vst.msk [vmem:[%s3005_s6 + $0x98] sm:$0xff] %vm492_vm1, %v790_v39 }
 0x301   :  { %988 = vrot.lane.b32.xlu1 %v1863_v3, %s1523_s27  ;;  %v804_v17 = vpop.permute.xlu0 %803 }
 0x302   :  { %1311 = vst.msk [vmem:[%s3005_s6 + $0xd0] sm:$0xff] %vm492_vm1, %v804_v17 }
 0x303   :  { %v806_v40 = vpop.permute.xlu1 %805  ;;  %1051 = vrot.lane.b32.xlu0 %v1870_v6, %s1524_s28 }
 0x304   :  { %1312 = vst.msk [vmem:[%s3005_s6 + $0xd8] sm:$0xff] %vm492_vm1, %v806_v40 }
 0x305   :  { %1004 = vrot.lane.b32.xlu1 %v1925_v30, %s1523_s27  ;;  %v853_v11 = vpop.permute.xlu0 %852 }
 0x306   :  { %1319 = vst.msk [vmem:[%s3003_s4 + $0x110] sm:$0xff] %vm492_vm1, %v853_v11 }
 0x307   :  { %v855_v24 = vpop.permute.xlu1 %854  ;;  %1067 = vrot.lane.b32.xlu0 %v1934_v32, %s1524_s28 }
 0x308   :  { %1320 = vst.msk [vmem:[%s3003_s4 + $0x118] sm:$0xff] %vm492_vm1, %v855_v24 }
 0x309   :  { %1053 = vrot.lane.b32.xlu1 %v1863_v3, %s1524_s28  ;;  %v869_v43 = vpop.permute.xlu0 %868 }
 0x30a   :  { %1327 = vst.msk [vmem:[%s3003_s4 + $0x150] sm:$0xff] %vm492_vm1, %v869_v43 }
 0x30b   :  { %v871_v44 = vpop.permute.xlu1 %870  ;;  %1116 = vrot.lane.b32.xlu0 %v1870_v6, %s1525_s0 }
 0x30c   :  { %1328 = vst.msk [vmem:[%s3003_s4 + $0x158] sm:$0xff] %vm492_vm1, %v871_v44 }
 0x30d   :  { %1069 = vrot.lane.b32.xlu1 %v1925_v30, %s1524_s28  ;;  %v918_v45 = vpop.permute.xlu0 %917 }
 0x30e   :  { %1335 = vst.msk [vmem:[%s3004_s5 + $0x110] sm:$0xff] %vm492_vm1, %v918_v45 }
 0x30f   :  { %v920_v21 = vpop.permute.xlu1 %919  ;;  %1132 = vrot.lane.b32.xlu0 %v1934_v32, %s1525_s0 }
 0x310   :  { %1336 = vst.msk [vmem:[%s3004_s5 + $0x118] sm:$0xff] %vm492_vm1, %v920_v21 }
 0x311   :  { %1118 = vrot.lane.b32.xlu1 %v1863_v3, %s1525_s0  ;;  %v934_v15 = vpop.permute.xlu0 %933 }
 0x312   :  { %1343 = vst.msk [vmem:[%s3004_s5 + $0x150] sm:$0xff] %vm492_vm1, %v934_v15 }
 0x313   :  { %v936_v25 = vpop.permute.xlu1 %935  ;;  %1181 = vrot.lane.b32.xlu0 %v1870_v6, %s1526_s29 }
 0x314   :  { %1344 = vst.msk [vmem:[%s3004_s5 + $0x158] sm:$0xff] %vm492_vm1, %v936_v25 }
 0x315   :  { %1134 = vrot.lane.b32.xlu1 %v1925_v30, %s1525_s0  ;;  %v983_v16 = vpop.permute.xlu0 %982 }
 0x316   :  { %1351 = vst.msk [vmem:[%s3005_s6 + $0x110] sm:$0xff] %vm492_vm1, %v983_v16 }
 0x317   :  { %v985_v48 = vpop.permute.xlu1 %984  ;;  %1197 = vrot.lane.b32.xlu0 %v1934_v32, %s1526_s29 }
 0x318   :  { %1352 = vst.msk [vmem:[%s3005_s6 + $0x118] sm:$0xff] %vm492_vm1, %v985_v48 }
 0x319   :  { %1183 = vrot.lane.b32.xlu1 %v1863_v3, %s1526_s29  ;;  %v999_v6 = vpop.permute.xlu0 %998 }
 0x31a   :  { %1359 = vst.msk [vmem:[%s3005_s6 + $0x150] sm:$0xff] %vm492_vm1, %v999_v6 }
 0x31b   :  { %v1001_v49 = vpop.permute.xlu1 %1000  ;;  %537 = vrot.lane.b32.xlu0 %v1884_v10, %s1516_s18 }
 0x31c   :  { %1360 = vst.msk [vmem:[%s3005_s6 + $0x158] sm:$0xff] %vm492_vm1, %v1001_v49 }
 0x31d   :  { %1199 = vrot.lane.b32.xlu1 %v1925_v30, %s1526_s29  ;;  %v1048_v32 = vpop.permute.xlu0 %1047 }
 0x31e   :  { %1367 = vst.msk [vmem:[%s3003_s4 + $0x190] sm:$0xff] %vm492_vm1, %v1048_v32 }
 0x31f   :  { %v1050_v3 = vpop.permute.xlu1 %1049  ;;  %553 = vrot.lane.b32.xlu0 %v1952_v12, %s1516_s18 }
 0x320   :  { %1368 = vst.msk [vmem:[%s3003_s4 + $0x198] sm:$0xff] %vm492_vm1, %v1050_v3 }
 0x321   :  { %539 = vrot.lane.b32.xlu1 %v1877_v8, %s1516_s18  ;;  %v1064_v50 = vpop.permute.xlu0 %1063 }
 0x322   :  { %1375 = vst.msk [vmem:[%s3003_s4 + $0x1d0] sm:$0xff] %vm492_vm1, %v1064_v50 }
 0x323   :  { %v1066_v30 = vpop.permute.xlu1 %1065  ;;  %601 = vrot.lane.b32.xlu0 %v1884_v10, %s1517_s12 }
 0x324   :  { %1376 = vst.msk [vmem:[%s3003_s4 + $0x1d8] sm:$0xff] %vm492_vm1, %v1066_v30 }
 0x325   :  { %555 = vrot.lane.b32.xlu1 %v1943_v36, %s1516_s18  ;;  %v1113_v51 = vpop.permute.xlu0 %1112 }
 0x326   :  { %1383 = vst.msk [vmem:[%s3004_s5 + $0x190] sm:$0xff] %vm492_vm1, %v1113_v51 }
 0x327   :  { %v1115_v29 = vpop.permute.xlu1 %1114  ;;  %617 = vrot.lane.b32.xlu0 %v1952_v12, %s1517_s12 }
 0x328   :  { %1384 = vst.msk [vmem:[%s3004_s5 + $0x198] sm:$0xff] %vm492_vm1, %v1115_v29 }
 0x329   :  { %603 = vrot.lane.b32.xlu1 %v1877_v8, %s1517_s12  ;;  %v1129_v9 = vpop.permute.xlu0 %1128 }
 0x32a   :  { %1391 = vst.msk [vmem:[%s3004_s5 + $0x1d0] sm:$0xff] %vm492_vm1, %v1129_v9 }
 0x32b   :  { %v1131_v47 = vpop.permute.xlu1 %1130  ;;  %665 = vrot.lane.b32.xlu0 %v1884_v10, %s1518_s20 }
 0x32c   :  { %1392 = vst.msk [vmem:[%s3004_s5 + $0x1d8] sm:$0xff] %vm492_vm1, %v1131_v47 }
 0x32d   :  { %619 = vrot.lane.b32.xlu1 %v1943_v36, %s1517_s12  ;;  %v1178_v31 = vpop.permute.xlu0 %1177 }
 0x32e   :  { %1399 = vst.msk [vmem:[%s3005_s6 + $0x190] sm:$0xff] %vm492_vm1, %v1178_v31 }
 0x32f   :  { %v1180_v53 = vpop.permute.xlu1 %1179  ;;  %681 = vrot.lane.b32.xlu0 %v1952_v12, %s1518_s20 }
 0x330   :  { %1400 = vst.msk [vmem:[%s3005_s6 + $0x198] sm:$0xff] %vm492_vm1, %v1180_v53 }
 0x331   :  { %667 = vrot.lane.b32.xlu1 %v1877_v8, %s1518_s20  ;;  %v1194_v54 = vpop.permute.xlu0 %1193 }
 0x332   :  { %1407 = vst.msk [vmem:[%s3005_s6 + $0x1d0] sm:$0xff] %vm492_vm1, %v1194_v54 }
 0x333   :  { %v1196_v55 = vpop.permute.xlu1 %1195  ;;  %730 = vrot.lane.b32.xlu0 %v1884_v10, %s1519_s23 }
 0x334   :  { %1408 = vst.msk [vmem:[%s3005_s6 + $0x1d8] sm:$0xff] %vm492_vm1, %v1196_v55 }
 0x335   :  { %683 = vrot.lane.b32.xlu1 %v1943_v36, %s1518_s20  ;;  %v534_v56 = vpop.permute.xlu0 %533 }
 0x336   :  { %577 = vst.msk [vmem:[%s3004_s5 + $0x20] sm:$0xff] %vm492_vm1, %v534_v56 }
 0x337   :  { %v530_v57 = vpop.permute.xlu1 %529  ;;  %746 = vrot.lane.b32.xlu0 %v1952_v12, %s1519_s23 }
 0x338   :  { %575 = vst.msk [vmem:[%s3004_s5 + $0x10] sm:$0xff] %vm492_vm1, %v530_v57 }
 0x339   :  { %732 = vrot.lane.b32.xlu1 %v1877_v8, %s1519_s23  ;;  %v550_v41 = vpop.permute.xlu0 %549 }
 0x33a   :  { %585 = vst.msk [vmem:[%s3004_s5 + $0x60] sm:$0xff] %vm492_vm1, %v550_v41 }
 0x33b   :  { %v536_v42 = vpop.permute.xlu1 %535  ;;  %795 = vrot.lane.b32.xlu0 %v1884_v10, %s1520_s24 }
 0x33c   :  { %578 = vst.msk [vmem:[%s3004_s5 + $0x28] sm:$0xff] %vm492_vm1, %v536_v42 }
 0x33d   :  { %748 = vrot.lane.b32.xlu1 %v1943_v36, %s1519_s23  ;;  %v598_v59 = vpop.permute.xlu0 %597 }
 0x33e   :  { %641 = vst.msk [vmem:[%s3005_s6 + $0x20] sm:$0xff] %vm492_vm1, %v598_v59 }
 0x33f   :  { %v552_v60 = vpop.permute.xlu1 %551  ;;  %811 = vrot.lane.b32.xlu0 %v1952_v12, %s1520_s24 }
 0x340   :  { %586 = vst.msk [vmem:[%s3004_s5 + $0x68] sm:$0xff] %vm492_vm1, %v552_v60 }
 0x341   :  { %797 = vrot.lane.b32.xlu1 %v1877_v8, %s1520_s24  ;;  %v614_v52 = vpop.permute.xlu0 %613 }
 0x342   :  { %649 = vst.msk [vmem:[%s3005_s6 + $0x60] sm:$0xff] %vm492_vm1, %v614_v52 }
 0x343   :  { %v600_v46 = vpop.permute.xlu1 %599  ;;  %860 = vrot.lane.b32.xlu0 %v1884_v10, %s1521_s25 }
 0x344   :  { %642 = vst.msk [vmem:[%s3005_s6 + $0x28] sm:$0xff] %vm492_vm1, %v600_v46 }
 0x345   :  { %813 = vrot.lane.b32.xlu1 %v1943_v36, %s1520_s24  ;;  %v662_v18 = vpop.permute.xlu0 %661 }
 0x346   :  { %1273 = vst.msk [vmem:[%s3003_s4 + $0xa0] sm:$0xff] %vm492_vm1, %v662_v18 }
 0x347   :  { %v616_v2 = vpop.permute.xlu1 %615  ;;  %876 = vrot.lane.b32.xlu0 %v1952_v12, %s1521_s25 }
 0x348   :  { %650 = vst.msk [vmem:[%s3005_s6 + $0x68] sm:$0xff] %vm492_vm1, %v616_v2 }
 0x349   :  { %862 = vrot.lane.b32.xlu1 %v1877_v8, %s1521_s25  ;;  %v678_v61 = vpop.permute.xlu0 %677 }
 0x34a   :  { %1281 = vst.msk [vmem:[%s3003_s4 + $0xe0] sm:$0xff] %vm492_vm1, %v678_v61 }
 0x34b   :  { %v664_v62 = vpop.permute.xlu1 %663  ;;  %925 = vrot.lane.b32.xlu0 %v1884_v10, %s1522_s26 }
 0x34c   :  { %1274 = vst.msk [vmem:[%s3003_s4 + $0xa8] sm:$0xff] %vm492_vm1, %v664_v62 }
 0x34d   :  { %878 = vrot.lane.b32.xlu1 %v1943_v36, %s1521_s25  ;;  %v727_v63 = vpop.permute.xlu0 %726 }
 0x34e   :  { %1289 = vst.msk [vmem:[%s3004_s5 + $0xa0] sm:$0xff] %vm492_vm1, %v727_v63 }
 0x34f   :  { %v680_v0 = vpop.permute.xlu1 %679  ;;  %941 = vrot.lane.b32.xlu0 %v1952_v12, %s1522_s26 }
 0x350   :  { %1282 = vst.msk [vmem:[%s3003_s4 + $0xe8] sm:$0xff] %vm492_vm1, %v680_v0 }
 0x351   :  { %927 = vrot.lane.b32.xlu1 %v1877_v8, %s1522_s26  ;;  %v743_v4 = vpop.permute.xlu0 %742 }
 0x352   :  { %1297 = vst.msk [vmem:[%s3004_s5 + $0xe0] sm:$0xff] %vm492_vm1, %v743_v4 }
 0x353   :  { %v729_v7 = vpop.permute.xlu1 %728  ;;  %990 = vrot.lane.b32.xlu0 %v1884_v10, %s1523_s27 }
 0x354   :  { %1290 = vst.msk [vmem:[%s3004_s5 + $0xa8] sm:$0xff] %vm492_vm1, %v729_v7 }
 0x355   :  { %943 = vrot.lane.b32.xlu1 %v1943_v36, %s1522_s26  ;;  %v792_v58 = vpop.permute.xlu0 %791 }
 0x356   :  { %1305 = vst.msk [vmem:[%s3005_s6 + $0xa0] sm:$0xff] %vm492_vm1, %v792_v58 }
 0x357   :  { %v745_v14 = vpop.permute.xlu1 %744  ;;  %1006 = vrot.lane.b32.xlu0 %v1952_v12, %s1523_s27 }
 0x358   :  { %1298 = vst.msk [vmem:[%s3004_s5 + $0xe8] sm:$0xff] %vm492_vm1, %v745_v14 }
 0x359   :  { %992 = vrot.lane.b32.xlu1 %v1877_v8, %s1523_s27  ;;  %v808_v19 = vpop.permute.xlu0 %807 }
 0x35a   :  { %1313 = vst.msk [vmem:[%s3005_s6 + $0xe0] sm:$0xff] %vm492_vm1, %v808_v19 }
 0x35b   :  { %v794_v20 = vpop.permute.xlu1 %793  ;;  %1055 = vrot.lane.b32.xlu0 %v1884_v10, %s1524_s28 }
 0x35c   :  { %1306 = vst.msk [vmem:[%s3005_s6 + $0xa8] sm:$0xff] %vm492_vm1, %v794_v20 }
 0x35d   :  { %1008 = vrot.lane.b32.xlu1 %v1943_v36, %s1523_s27  ;;  %v857_v22 = vpop.permute.xlu0 %856 }
 0x35e   :  { %1321 = vst.msk [vmem:[%s3003_s4 + $0x120] sm:$0xff] %vm492_vm1, %v857_v22 }
 0x35f   :  { %v810_v23 = vpop.permute.xlu1 %809  ;;  %1071 = vrot.lane.b32.xlu0 %v1952_v12, %s1524_s28 }
 0x360   :  { %1314 = vst.msk [vmem:[%s3005_s6 + $0xe8] sm:$0xff] %vm492_vm1, %v810_v23 }
 0x361   :  { %1057 = vrot.lane.b32.xlu1 %v1877_v8, %s1524_s28  ;;  %v873_v26 = vpop.permute.xlu0 %872 }
 0x362   :  { %1329 = vst.msk [vmem:[%s3003_s4 + $0x160] sm:$0xff] %vm492_vm1, %v873_v26 }
 0x363   :  { %v859_v5 = vpop.permute.xlu1 %858  ;;  %1120 = vrot.lane.b32.xlu0 %v1884_v10, %s1525_s0 }
 0x364   :  { %1322 = vst.msk [vmem:[%s3003_s4 + $0x128] sm:$0xff] %vm492_vm1, %v859_v5 }
 0x365   :  { %1073 = vrot.lane.b32.xlu1 %v1943_v36, %s1524_s28  ;;  %v922_v1 = vpop.permute.xlu0 %921 }
 0x366   :  { %1337 = vst.msk [vmem:[%s3004_s5 + $0x120] sm:$0xff] %vm492_vm1, %v922_v1 }
 0x367   :  { %v875_v27 = vpop.permute.xlu1 %874  ;;  %1136 = vrot.lane.b32.xlu0 %v1952_v12, %s1525_s0 }
 0x368   :  { %1330 = vst.msk [vmem:[%s3003_s4 + $0x168] sm:$0xff] %vm492_vm1, %v875_v27 }
 0x369   :  { %1122 = vrot.lane.b32.xlu1 %v1877_v8, %s1525_s0  ;;  %v938_v28 = vpop.permute.xlu0 %937 }
 0x36a   :  { %1345 = vst.msk [vmem:[%s3004_s5 + $0x160] sm:$0xff] %vm492_vm1, %v938_v28 }
 0x36b   :  { %v924_v33 = vpop.permute.xlu1 %923  ;;  %1185 = vrot.lane.b32.xlu0 %v1884_v10, %s1526_s29 }
 0x36c   :  { %1338 = vst.msk [vmem:[%s3004_s5 + $0x128] sm:$0xff] %vm492_vm1, %v924_v33 }
 0x36d   :  { %1138 = vrot.lane.b32.xlu1 %v1943_v36, %s1525_s0  ;;  %v987_v34 = vpop.permute.xlu0 %986 }
 0x36e   :  { %1353 = vst.msk [vmem:[%s3005_s6 + $0x120] sm:$0xff] %vm492_vm1, %v987_v34 }
 0x36f   :  { %v940_v35 = vpop.permute.xlu1 %939  ;;  %1201 = vrot.lane.b32.xlu0 %v1952_v12, %s1526_s29 }
 0x370   :  { %1346 = vst.msk [vmem:[%s3004_s5 + $0x168] sm:$0xff] %vm492_vm1, %v940_v35 }
 0x371   :  { %1187 = vrot.lane.b32.xlu1 %v1877_v8, %s1526_s29  ;;  %v1003_v10 = vpop.permute.xlu0 %1002 }
 0x372   :  { %1361 = vst.msk [vmem:[%s3005_s6 + $0x160] sm:$0xff] %vm492_vm1, %v1003_v10 }
 0x373   :  { %v989_v13 = vpop.permute.xlu1 %988 }
 0x374   :  { %1354 = vst.msk [vmem:[%s3005_s6 + $0x128] sm:$0xff] %vm492_vm1, %v989_v13 }
 0x375   :  { %1203 = vrot.lane.b32.xlu1 %v1943_v36, %s1526_s29  ;;  %v1052_v12 = vpop.permute.xlu0 %1051 }
 0x376   :  { %1369 = vst.msk [vmem:[%s3003_s4 + $0x1a0] sm:$0xff] %vm492_vm1, %v1052_v12 }
 0x377   :  { %v1005_v8 = vpop.permute.xlu1 %1004 }
 0x378   :  { %1362 = vst.msk [vmem:[%s3005_s6 + $0x168] sm:$0xff] %vm492_vm1, %v1005_v8 }
 0x379   :  { %v1068_v37 = vpop.permute.xlu0 %1067 }
 0x37a   :  { %1377 = vst.msk [vmem:[%s3003_s4 + $0x1e0] sm:$0xff] %vm492_vm1, %v1068_v37 }
 0x37b   :  { %v1054_v38 = vpop.permute.xlu1 %1053 }
 0x37c   :  { %1370 = vst.msk [vmem:[%s3003_s4 + $0x1a8] sm:$0xff] %vm492_vm1, %v1054_v38 }
 0x37d   :  { %v1117_v36 = vpop.permute.xlu0 %1116 }
 0x37e   :  { %1385 = vst.msk [vmem:[%s3004_s5 + $0x1a0] sm:$0xff] %vm492_vm1, %v1117_v36 }
 0x37f   :  { %v1070_v39 = vpop.permute.xlu1 %1069 }
 0x380   :  { %1378 = vst.msk [vmem:[%s3003_s4 + $0x1e8] sm:$0xff] %vm492_vm1, %v1070_v39 }
 0x381   :  { %v1133_v17 = vpop.permute.xlu0 %1132 }
 0x382   :  { %1393 = vst.msk [vmem:[%s3004_s5 + $0x1e0] sm:$0xff] %vm492_vm1, %v1133_v17 }
 0x383   :  { %v1119_v40 = vpop.permute.xlu1 %1118 }
 0x384   :  { %1386 = vst.msk [vmem:[%s3004_s5 + $0x1a8] sm:$0xff] %vm492_vm1, %v1119_v40 }
 0x385   :  { %v1182_v11 = vpop.permute.xlu0 %1181 }
 0x386   :  { %1401 = vst.msk [vmem:[%s3005_s6 + $0x1a0] sm:$0xff] %vm492_vm1, %v1182_v11 }
 0x387   :  { %v1135_v24 = vpop.permute.xlu1 %1134 }
 0x388   :  { %1394 = vst.msk [vmem:[%s3004_s5 + $0x1e8] sm:$0xff] %vm492_vm1, %v1135_v24 }
 0x389   :  { %v1198_v43 = vpop.permute.xlu0 %1197 }
 0x38a   :  { %1409 = vst.msk [vmem:[%s3005_s6 + $0x1e0] sm:$0xff] %vm492_vm1, %v1198_v43 }
 0x38b   :  { %v1184_v44 = vpop.permute.xlu1 %1183 }
 0x38c   :  { %1402 = vst.msk [vmem:[%s3005_s6 + $0x1a8] sm:$0xff] %vm492_vm1, %v1184_v44 }
 0x38d   :  { %v538_v45 = vpop.permute.xlu0 %537 }
 0x38e   :  { %579 = vst.msk [vmem:[%s3004_s5 + $0x30] sm:$0xff] %vm492_vm1, %v538_v45 }
 0x38f   :  { %v1200_v21 = vpop.permute.xlu1 %1199 }
 0x390   :  { %1410 = vst.msk [vmem:[%s3005_s6 + $0x1e8] sm:$0xff] %vm492_vm1, %v1200_v21 }
 0x391   :  { %v554_v15 = vpop.permute.xlu0 %553 }
 0x392   :  { %587 = vst.msk [vmem:[%s3004_s5 + $0x70] sm:$0xff] %vm492_vm1, %v554_v15 }
 0x393   :  { %v540_v25 = vpop.permute.xlu1 %539 }
 0x394   :  { %580 = vst.msk [vmem:[%s3004_s5 + $0x38] sm:$0xff] %vm492_vm1, %v540_v25 }
 0x395   :  { %v602_v16 = vpop.permute.xlu0 %601 }
 0x396   :  { %643 = vst.msk [vmem:[%s3005_s6 + $0x30] sm:$0xff] %vm492_vm1, %v602_v16 }
 0x397   :  { %v556_v48 = vpop.permute.xlu1 %555 }
 0x398   :  { %588 = vst.msk [vmem:[%s3004_s5 + $0x78] sm:$0xff] %vm492_vm1, %v556_v48 }
 0x399   :  { %v618_v6 = vpop.permute.xlu0 %617 }
 0x39a   :  { %651 = vst.msk [vmem:[%s3005_s6 + $0x70] sm:$0xff] %vm492_vm1, %v618_v6 }
 0x39b   :  { %v604_v49 = vpop.permute.xlu1 %603 }
 0x39c   :  { %644 = vst.msk [vmem:[%s3005_s6 + $0x38] sm:$0xff] %vm492_vm1, %v604_v49 }
 0x39d   :  { %v666_v32 = vpop.permute.xlu0 %665 }
 0x39e   :  { %1275 = vst.msk [vmem:[%s3003_s4 + $0xb0] sm:$0xff] %vm492_vm1, %v666_v32 }
 0x39f   :  { %v620_v3 = vpop.permute.xlu1 %619 }
 0x3a0   :  { %652 = vst.msk [vmem:[%s3005_s6 + $0x78] sm:$0xff] %vm492_vm1, %v620_v3 }
 0x3a1   :  { %v682_v50 = vpop.permute.xlu0 %681 }
 0x3a2   :  { %1283 = vst.msk [vmem:[%s3003_s4 + $0xf0] sm:$0xff] %vm492_vm1, %v682_v50 }
 0x3a3   :  { %v668_v30 = vpop.permute.xlu1 %667 }
 0x3a4   :  { %1276 = vst.msk [vmem:[%s3003_s4 + $0xb8] sm:$0xff] %vm492_vm1, %v668_v30 }
 0x3a5   :  { %v731_v51 = vpop.permute.xlu0 %730 }
 0x3a6   :  { %1291 = vst.msk [vmem:[%s3004_s5 + $0xb0] sm:$0xff] %vm492_vm1, %v731_v51 }
 0x3a7   :  { %v684_v29 = vpop.permute.xlu1 %683 }
 0x3a8   :  { %1284 = vst.msk [vmem:[%s3003_s4 + $0xf8] sm:$0xff] %vm492_vm1, %v684_v29 }
 0x3a9   :  { %v747_v9 = vpop.permute.xlu0 %746 }
 0x3aa   :  { %1299 = vst.msk [vmem:[%s3004_s5 + $0xf0] sm:$0xff] %vm492_vm1, %v747_v9 }
 0x3ab   :  { %v733_v47 = vpop.permute.xlu1 %732 }
 0x3ac   :  { %1292 = vst.msk [vmem:[%s3004_s5 + $0xb8] sm:$0xff] %vm492_vm1, %v733_v47 }
 0x3ad   :  { %v796_v31 = vpop.permute.xlu0 %795 }
 0x3ae   :  { %1307 = vst.msk [vmem:[%s3005_s6 + $0xb0] sm:$0xff] %vm492_vm1, %v796_v31 }
 0x3af   :  { %v749_v53 = vpop.permute.xlu1 %748 }
 0x3b0   :  { %1300 = vst.msk [vmem:[%s3004_s5 + $0xf8] sm:$0xff] %vm492_vm1, %v749_v53 }
 0x3b1   :  { %v812_v54 = vpop.permute.xlu0 %811 }
 0x3b2   :  { %1315 = vst.msk [vmem:[%s3005_s6 + $0xf0] sm:$0xff] %vm492_vm1, %v812_v54 }
 0x3b3   :  { %v798_v55 = vpop.permute.xlu1 %797 }
 0x3b4   :  { %1308 = vst.msk [vmem:[%s3005_s6 + $0xb8] sm:$0xff] %vm492_vm1, %v798_v55 }
 0x3b5   :  { %v861_v56 = vpop.permute.xlu0 %860 }
 0x3b6   :  { %1323 = vst.msk [vmem:[%s3003_s4 + $0x130] sm:$0xff] %vm492_vm1, %v861_v56 }
 0x3b7   :  { %v814_v57 = vpop.permute.xlu1 %813 }
 0x3b8   :  { %1316 = vst.msk [vmem:[%s3005_s6 + $0xf8] sm:$0xff] %vm492_vm1, %v814_v57 }
 0x3b9   :  { %v877_v41 = vpop.permute.xlu0 %876 }
 0x3ba   :  { %1331 = vst.msk [vmem:[%s3003_s4 + $0x170] sm:$0xff] %vm492_vm1, %v877_v41 }
 0x3bb   :  { %v863_v42 = vpop.permute.xlu1 %862 }
 0x3bc   :  { %1324 = vst.msk [vmem:[%s3003_s4 + $0x138] sm:$0xff] %vm492_vm1, %v863_v42 }
 0x3bd   :  { %v926_v59 = vpop.permute.xlu0 %925 }
 0x3be   :  { %1339 = vst.msk [vmem:[%s3004_s5 + $0x130] sm:$0xff] %vm492_vm1, %v926_v59 }
 0x3bf   :  { %v879_v60 = vpop.permute.xlu1 %878 }
 0x3c0   :  { %1332 = vst.msk [vmem:[%s3003_s4 + $0x178] sm:$0xff] %vm492_vm1, %v879_v60 }
 0x3c1   :  { %v942_v52 = vpop.permute.xlu0 %941 }
 0x3c2   :  { %1347 = vst.msk [vmem:[%s3004_s5 + $0x170] sm:$0xff] %vm492_vm1, %v942_v52 }
 0x3c3   :  { %v928_v46 = vpop.permute.xlu1 %927 }
 0x3c4   :  { %1340 = vst.msk [vmem:[%s3004_s5 + $0x138] sm:$0xff] %vm492_vm1, %v928_v46 }
 0x3c5   :  { %v991_v18 = vpop.permute.xlu0 %990 }
 0x3c6   :  { %1355 = vst.msk [vmem:[%s3005_s6 + $0x130] sm:$0xff] %vm492_vm1, %v991_v18 }
 0x3c7   :  { %v944_v2 = vpop.permute.xlu1 %943 }
 0x3c8   :  { %1348 = vst.msk [vmem:[%s3004_s5 + $0x178] sm:$0xff] %vm492_vm1, %v944_v2 }
 0x3c9   :  { %v1007_v61 = vpop.permute.xlu0 %1006 }
 0x3ca   :  { %1363 = vst.msk [vmem:[%s3005_s6 + $0x170] sm:$0xff] %vm492_vm1, %v1007_v61 }
 0x3cb   :  { %v993_v62 = vpop.permute.xlu1 %992 }
 0x3cc   :  { %1356 = vst.msk [vmem:[%s3005_s6 + $0x138] sm:$0xff] %vm492_vm1, %v993_v62 }
 0x3cd   :  { %v1056_v63 = vpop.permute.xlu0 %1055 }
 0x3ce   :  { %1371 = vst.msk [vmem:[%s3003_s4 + $0x1b0] sm:$0xff] %vm492_vm1, %v1056_v63 }
 0x3cf   :  { %v1009_v0 = vpop.permute.xlu1 %1008 }
 0x3d0   :  { %1364 = vst.msk [vmem:[%s3005_s6 + $0x178] sm:$0xff] %vm492_vm1, %v1009_v0 }
 0x3d1   :  { %v1072_v4 = vpop.permute.xlu0 %1071 }
 0x3d2   :  { %1379 = vst.msk [vmem:[%s3003_s4 + $0x1f0] sm:$0xff] %vm492_vm1, %v1072_v4 }
 0x3d3   :  { %v1058_v7 = vpop.permute.xlu1 %1057 }
 0x3d4   :  { %1372 = vst.msk [vmem:[%s3003_s4 + $0x1b8] sm:$0xff] %vm492_vm1, %v1058_v7 }
 0x3d5   :  { %v1121_v58 = vpop.permute.xlu0 %1120 }
 0x3d6   :  { %1387 = vst.msk [vmem:[%s3004_s5 + $0x1b0] sm:$0xff] %vm492_vm1, %v1121_v58 }
 0x3d7   :  { %v1074_v14 = vpop.permute.xlu1 %1073 }
 0x3d8   :  { %1380 = vst.msk [vmem:[%s3003_s4 + $0x1f8] sm:$0xff] %vm492_vm1, %v1074_v14 }
 0x3d9   :  { %v1137_v19 = vpop.permute.xlu0 %1136 }
 0x3da   :  { %1395 = vst.msk [vmem:[%s3004_s5 + $0x1f0] sm:$0xff] %vm492_vm1, %v1137_v19 }
 0x3db   :  { %v1123_v20 = vpop.permute.xlu1 %1122 }
 0x3dc   :  { %1388 = vst.msk [vmem:[%s3004_s5 + $0x1b8] sm:$0xff] %vm492_vm1, %v1123_v20 }
 0x3dd   :  { %v1186_v22 = vpop.permute.xlu0 %1185 }
 0x3de   :  { %1403 = vst.msk [vmem:[%s3005_s6 + $0x1b0] sm:$0xff] %vm492_vm1, %v1186_v22 }
 0x3df   :  { %v1139_v23 = vpop.permute.xlu1 %1138 }
 0x3e0   :  { %1396 = vst.msk [vmem:[%s3004_s5 + $0x1f8] sm:$0xff] %vm492_vm1, %v1139_v23 }
 0x3e1   :  { %v1202_v26 = vpop.permute.xlu0 %1201 }
 0x3e2   :  { %1411 = vst.msk [vmem:[%s3005_s6 + $0x1f0] sm:$0xff] %vm492_vm1, %v1202_v26 }
 0x3e3   :  { %v1188_v5 = vpop.permute.xlu1 %1187 }
 0x3e4   :  { %1404 = vst.msk [vmem:[%s3005_s6 + $0x1b8] sm:$0xff] %vm492_vm1, %v1188_v5 }
 0x3e7   :  { %v1204_v1 = vpop.permute.xlu1 %1203 }
 0x3e8   :  { %1412 = vst.msk [vmem:[%s3005_s6 + $0x1f8] sm:$0xff] %vm492_vm1, %v1204_v1 }

</bundles_post_ra>
